<compile_context>
chip_gen: v7x
topology: tpu7x:2x2x1
jax: 0.10.0
libtpu: 0.0.40
codegen_flags: <defaults>
</compile_context>

<pallas_src>
import functools

import jax
import jax.numpy as jnp
from jax.experimental import pallas as pl
from jax.experimental.pallas import tpu as pltpu


def _round_up(x, m):
    return ((x + m - 1) // m) * m


def _gelu_exact(x):
    # PyTorch nn.GELU() default is the exact erf formulation.
    return 0.5 * x * (1.0 + jax.lax.erf(x * 0.7071067811865476))


def _vmem_capacity_bytes():
    # Generation-aware: 128 MiB on v5e/v6e, 64 MiB/TC on v7x.  Fall back conservatively.
    try:
        return int(pltpu.get_tpu_info().vmem_capacity_bytes)
    except Exception:
        return 64 << 20


def _pick_tile_h(hidden, cap=2048):
    # Largest hidden chunk that exactly divides `hidden`, is lane-aligned (multiple of 128) and
    # no bigger than `cap`.  Exact division is required: out-of-bounds hidden columns would be
    # accumulated into the output otherwise.
    if hidden <= cap or hidden % 128 != 0:
        return hidden
    best = 128
    t = 128
    while t <= cap:
        if hidden % t == 0:
            best = t
        t += 128
    return best


def feedforward_kernel(x_ref, g_ref, b_ref, w1_ref, b1_ref, w2_ref, b2_ref,
                       o_ref, xn_ref, acc_ref, *, eps):
    h_idx = pl.program_id(1)

    @pl.when(h_idx == 0)
    def _():
        # LayerNorm with one-pass statistics: E[x] and E[x^2] from a single traversal.
        x = x_ref[...].astype(jnp.float32)
        inv_d = 1.0 / x.shape[-1]
        mean = jnp.sum(x, axis=-1, keepdims=True) * inv_d
        ex2 = jnp.sum(x * x, axis=-1, keepdims=True) * inv_d
        var = ex2 - mean * mean
        xn = (x - mean) * jax.lax.rsqrt(var + eps)          # eps == hidden_dim quirk
        xn = xn * g_ref[...].astype(jnp.float32) + b_ref[...].astype(jnp.float32)
        xn_ref[...] = xn.astype(xn_ref.dtype)               # cached (MXU dtype) across h-chunks
        acc_ref[...] = jnp.zeros_like(acc_ref)

    # Linear(dim -> hidden chunk) on the MXU: native-dtype operands, f32 accumulation.
    h = jnp.dot(xn_ref[...], w1_ref[...], preferred_element_type=jnp.float32)
    h = h + b1_ref[...].astype(jnp.float32)
    h = _gelu_exact(h)
    # Dropout(p=0.0) == identity -> no-op.

    # Linear(hidden chunk -> dim), accumulated into the resident f32 scratch.
    acc_ref[...] += jnp.dot(h.astype(w2_ref.dtype), w2_ref[...],
                            preferred_element_type=jnp.float32)

    @pl.when(h_idx == pl.num_programs(1) - 1)
    def _():
        out = acc_ref[...] + b2_ref[...].astype(jnp.float32)
        # Dropout(p=0.0) == identity -> no-op.
        o_ref[...] = out.astype(o_ref.dtype)


def feedforward(x, gamma, beta, w1, b1, w2, b2, *, eps,
                tile_m=None, tile_h=None, mxu_dtype=jnp.bfloat16):
    """x: (batch, seq, dim).  Weights are stored (in, out) so the kernel computes x @ W."""
    batch, seq, dim = x.shape
    hidden = w1.shape[1]
    n = batch * seq
    x2 = x.reshape(n, dim)                       # reshape is free (no copy)

    # MXU-friendly weight dtype; f32 accumulation is preserved in-kernel.
    if mxu_dtype is not None:
        w1 = w1.astype(mxu_dtype)
        w2 = w2.astype(mxu_dtype)
    mdt = w1.dtype
    w_item = jnp.dtype(mdt).itemsize
    x_item = x.dtype.itemsize

    # Hidden chunking (must divide hidden exactly and be lane-aligned).
    if tile_h is None:
        tile_h = _pick_tile_h(hidden)
    assert hidden % tile_h == 0, "tile_h must divide hidden exactly"
    assert tile_h == hidden or tile_h % 128 == 0, "tile_h must be a multiple of 128"
    grid_h = hidden // tile_h

    # Row tile: MXU-friendly, shrunk to this generation's VMEM budget.
    vmem_cap = _vmem_capacity_bytes()
    budget = int(vmem_cap * 0.85)
    if tile_m is None:
        tile_m = 512                              # multiple of 256 -> full MXU tiles on v6e/v7x
    tile_m = min(int(tile_m), _round_up(n, 8))
    tile_m = max(8, _round_up(tile_m, 8))

    def est_bytes(tm):
        return (2 * tm * dim * x_item                      # x tile (double-buffered)
                + 2 * tm * dim * x_item                    # out tile (double-buffered)
                + 2 * 2 * dim * tile_h * w_item            # W1 + W2 chunks (double-buffered)
                + 2 * (tile_h + 3 * dim) * 4               # bias / LN vectors
                + tm * dim * w_item                        # xn scratch
                + tm * dim * 4                             # f32 output accumulator
                + tm * tile_h * 4)                         # f32 hidden-chunk intermediate

    while est_bytes(tile_m) > budget and tile_m > 8:
        tile_m = max(8, _round_up(tile_m // 2, 8))
    assert est_bytes(tile_m) <= budget, (
        f"VMEM estimate {est_bytes(tile_m) / 2**20:.1f} MiB exceeds budget "
        f"{budget / 2**20:.1f} MiB; reduce tile_h.")

    grid_m = pl.cdiv(n, tile_m)                   # partial tail block; no pad/slice round-trip
    vmem_limit = int(min(max(est_bytes(tile_m) + (16 << 20), 32 << 20), vmem_cap))

    flops = 4 * n * dim * hidden                  # two GEMMs, 2 flops per MAC
    bytes_accessed = (2 * n * dim * x_item                           # x in + out
                      + int(grid_m) * 2 * dim * hidden * w_item      # weights streamed per row tile
                      + (hidden + 3 * dim) * 4)                      # bias / LN vectors

    kernel = functools.partial(feedforward_kernel, eps=float(eps))

    out2 = pl.pallas_call(
        kernel,
        out_shape=jax.ShapeDtypeStruct((n, dim), x.dtype),
        grid_spec=pltpu.PrefetchScalarGridSpec(
            num_scalar_prefetch=0,
            grid=(grid_m, grid_h),
            in_specs=[
                pl.BlockSpec((tile_m, dim), lambda i, h: (i, 0)),      # x rows
                pl.BlockSpec((1, dim), lambda i, h: (0, 0)),           # LayerNorm gamma
                pl.BlockSpec((1, dim), lambda i, h: (0, 0)),           # LayerNorm beta
                pl.BlockSpec((dim, tile_h), lambda i, h: (0, h)),      # W1 chunk (streams over h)
                pl.BlockSpec((1, tile_h), lambda i, h: (0, h)),        # b1 chunk
                pl.BlockSpec((tile_h, dim), lambda i, h: (h, 0)),      # W2 chunk (streams over h)
                pl.BlockSpec((1, dim), lambda i, h: (0, 0)),           # b2
            ],
            out_specs=pl.BlockSpec((tile_m, dim), lambda i, h: (i, 0)),
            scratch_shapes=[
                pltpu.VMEM((tile_m, dim), mdt),          # cached LayerNorm output
                pltpu.VMEM((tile_m, dim), jnp.float32),  # f32 output accumulator
            ],
        ),
        compiler_params=pltpu.CompilerParams(
            dimension_semantics=("parallel", "arbitrary"),
            vmem_limit_bytes=vmem_limit,
        ),
        cost_estimate=pl.CostEstimate(
            flops=int(flops),
            transcendentals=int(n * hidden),             # erf over the activation
            bytes_accessed=int(bytes_accessed),
        ),
    )(x2, gamma, beta, w1, b1, w2, b2)

    return out2.reshape(batch, seq, dim)


if __name__ == "__main__":
    # Lane-dense feature dims; seq chosen so the row count (260) exercises a partial tail block,
    # tile_h=128 exercises the hidden-chunk accumulation loop (hidden=256 -> 2 chunks).
    batch, seq, dim, hidden_dim = 2, 130, 128, 256

    key = jax.random.PRNGKey(0)
    kx, kg, kb, kw1, kb1, kw2, kb2 = jax.random.split(key, 7)

    x = jax.random.normal(kx, (batch, seq, dim), dtype=jnp.float32)

    gamma = 1.0 + 0.05 * jax.random.normal(kg, (1, dim), dtype=jnp.float32)
    beta = 0.05 * jax.random.normal(kb, (1, dim), dtype=jnp.float32)
    w1 = jax.random.normal(kw1, (dim, hidden_dim), dtype=jnp.float32) * 0.02
    b1 = jax.random.normal(kb1, (1, hidden_dim), dtype=jnp.float32) * 0.02
    w2 = jax.random.normal(kw2, (hidden_dim, dim), dtype=jnp.float32) * 0.02
    b2 = jax.random.normal(kb2, (1, dim), dtype=jnp.float32) * 0.02

    eps = float(hidden_dim)  # nn.LayerNorm(dim, hidden_dim) -> eps = hidden_dim quirk

    out = feedforward(x, gamma, beta, w1, b1, w2, b2, eps=eps,
                      tile_m=128, tile_h=128, mxu_dtype=jnp.bfloat16)
    out = jax.block_until_ready(out)

    # Pure-JAX reference with the same MXU dtype handling (bf16 operands, f32 accumulation).
    mdt = jnp.bfloat16

    def ref(xx):
        xx = xx.astype(jnp.float32)
        mean = jnp.mean(xx, axis=-1, keepdims=True)
        var = jnp.mean(jnp.square(xx - mean), axis=-1, keepdims=True)
        xn = (xx - mean) / jnp.sqrt(var + eps)
        xn = xn * gamma[0] + beta[0]
        h = jnp.dot(xn.astype(mdt), w1.astype(mdt),
                    preferred_element_type=jnp.float32) + b1[0]
        h = 0.5 * h * (1.0 + jax.lax.erf(h / jnp.sqrt(2.0)))
        return jnp.dot(h.astype(mdt), w2.astype(mdt),
                       preferred_element_type=jnp.float32) + b2[0]

    expected = ref(x)
    assert out.shape == (batch, seq, dim)
    max_err = float(jnp.max(jnp.abs(out - expected)))
    assert max_err < 2e-3, f"mismatch vs reference, max abs err = {max_err}"

    print("KERNEL_OK")
</pallas_src>

<mosaic_0001>
module attributes {stable_mosaic.version = 11 : i64} {
  func.func @feedforward_kernel(%arg0: i32, %arg1: i32, %arg2: memref<128x128xf32, #tpu.memory_space<vmem>>, %arg3: memref<1x128xf32, #tpu.memory_space<vmem>>, %arg4: memref<1x128xf32, #tpu.memory_space<vmem>>, %arg5: memref<128x128xbf16, #tpu.memory_space<vmem>>, %arg6: memref<1x128xf32, #tpu.memory_space<vmem>>, %arg7: memref<128x128xbf16, #tpu.memory_space<vmem>>, %arg8: memref<1x128xf32, #tpu.memory_space<vmem>>, %arg9: memref<128x128xf32, #tpu.memory_space<vmem>>, %arg10: memref<128x128xbf16, #tpu.memory_space<vmem>>, %arg11: memref<128x128xf32, #tpu.memory_space<vmem>>) attributes {dimension_semantics = [#tpu.dimension_semantics<parallel>, #tpu.dimension_semantics<arbitrary>], iteration_bounds = array<i64: 3, 2>, scalar_prefetch = 0 : i64, scratch_operands = 2 : i64, tpu.core_type = #tpu.core_type<tc>, window_params = [{transform_indices = @transform_0, window_bounds = array<i64: 128, 128>}, {pipeline_mode = #tpu.pipeline_mode<synchronous>, transform_indices = @transform_1, window_bounds = array<i64: 1, 128>}, {pipeline_mode = #tpu.pipeline_mode<synchronous>, transform_indices = @transform_2, window_bounds = array<i64: 1, 128>}, {transform_indices = @transform_3, window_bounds = array<i64: 128, 128>}, {transform_indices = @transform_4, window_bounds = array<i64: 1, 128>}, {transform_indices = @transform_5, window_bounds = array<i64: 128, 128>}, {pipeline_mode = #tpu.pipeline_mode<synchronous>, transform_indices = @transform_6, window_bounds = array<i64: 1, 128>}, {transform_indices = @transform_7, window_bounds = array<i64: 128, 128>}]} {
    %c0_i32 = arith.constant 0 : i32
    %0 = arith.cmpi eq, %arg1, %c0_i32 : i32
    %1 = arith.extui %0 : i1 to i32
    %c0_i32_0 = arith.constant 0 : i32
    %2 = arith.cmpi ne, %1, %c0_i32_0 : i32
    scf.if %2 {
      %c0_17 = arith.constant 0 : index
      %c0_18 = arith.constant 0 : index
      %26 = vector.load %arg2[%c0_17, %c0_18] : memref<128x128xf32, #tpu.memory_space<vmem>>, vector<128x128xf32>
      %cst_19 = arith.constant dense<0.000000e+00> : vector<128xf32>
      %27 = vector.multi_reduction <add>, %26, %cst_19 [1] : vector<128x128xf32> to vector<128xf32>
      %28 = vector.shape_cast %27 : vector<128xf32> to vector<128x1xf32>
      %cst_20 = arith.constant 7.812500e-03 : f32
      %29 = vector.broadcast %cst_20 : f32 to vector<128x1xf32>
      %30 = arith.mulf %28, %29 : vector<128x1xf32>
      %31 = arith.mulf %26, %26 : vector<128x128xf32>
      %cst_21 = arith.constant dense<0.000000e+00> : vector<128xf32>
      %32 = vector.multi_reduction <add>, %31, %cst_21 [1] : vector<128x128xf32> to vector<128xf32>
      %33 = vector.shape_cast %32 : vector<128xf32> to vector<128x1xf32>
      %cst_22 = arith.constant 7.812500e-03 : f32
      %34 = vector.broadcast %cst_22 : f32 to vector<128x1xf32>
      %35 = arith.mulf %33, %34 : vector<128x1xf32>
      %36 = arith.mulf %30, %30 : vector<128x1xf32>
      %37 = arith.subf %35, %36 : vector<128x1xf32>
      %38 = vector.broadcast %30 : vector<128x1xf32> to vector<128x128xf32>
      %39 = arith.subf %26, %38 : vector<128x128xf32>
      %cst_23 = arith.constant 2.560000e+02 : f32
      %40 = vector.broadcast %cst_23 : f32 to vector<128x1xf32>
      %41 = arith.addf %37, %40 : vector<128x1xf32>
      %42 = math.rsqrt %41 : vector<128x1xf32>
      %43 = vector.broadcast %42 : vector<128x1xf32> to vector<128x128xf32>
      %44 = arith.mulf %39, %43 : vector<128x128xf32>
      %c0_24 = arith.constant 0 : index
      %c0_25 = arith.constant 0 : index
      %45 = vector.load %arg3[%c0_24, %c0_25] : memref<1x128xf32, #tpu.memory_space<vmem>>, vector<1x128xf32>
      %46 = vector.broadcast %45 : vector<1x128xf32> to vector<128x128xf32>
      %47 = arith.mulf %44, %46 : vector<128x128xf32>
      %c0_26 = arith.constant 0 : index
      %c0_27 = arith.constant 0 : index
      %48 = vector.load %arg4[%c0_26, %c0_27] : memref<1x128xf32, #tpu.memory_space<vmem>>, vector<1x128xf32>
      %49 = vector.broadcast %48 : vector<1x128xf32> to vector<128x128xf32>
      %50 = arith.addf %47, %49 : vector<128x128xf32>
      %51 = arith.truncf %50 : vector<128x128xf32> to vector<128x128xbf16>
      %c0_28 = arith.constant 0 : index
      %c0_29 = arith.constant 0 : index
      %52 = vector.load %arg10[%c0_28, %c0_29] : memref<128x128xbf16, #tpu.memory_space<vmem>>, vector<128x128xbf16>
      tpu.vector_store %arg10[%c0_28, %c0_29], %51 {strides = array<i32>} : memref<128x128xbf16, #tpu.memory_space<vmem>>, vector<128x128xbf16>,
      %cst_30 = arith.constant 0.000000e+00 : f32
      %53 = vector.broadcast %cst_30 : f32 to vector<128x128xf32>
      %c0_31 = arith.constant 0 : index
      %c0_32 = arith.constant 0 : index
      %54 = vector.load %arg11[%c0_31, %c0_32] : memref<128x128xf32, #tpu.memory_space<vmem>>, vector<128x128xf32>
      tpu.vector_store %arg11[%c0_31, %c0_32], %53 {strides = array<i32>} : memref<128x128xf32, #tpu.memory_space<vmem>>, vector<128x128xf32>,
    } else {
    }
    %c0 = arith.constant 0 : index
    %c0_1 = arith.constant 0 : index
    %3 = vector.load %arg10[%c0, %c0_1] : memref<128x128xbf16, #tpu.memory_space<vmem>>, vector<128x128xbf16>
    %c0_2 = arith.constant 0 : index
    %c0_3 = arith.constant 0 : index
    %4 = vector.load %arg5[%c0_2, %c0_3] : memref<128x128xbf16, #tpu.memory_space<vmem>>, vector<128x128xbf16>
    %cst = arith.constant dense<0.000000e+00> : vector<128x128xf32>
    %5 = tpu.matmul %3, %4, %cst {dimension_numbers = #tpu.dot_dimension_numbers<[1], [0], [0], [1], [0, 0, 1, 1], [], []>} : vector<128x128xbf16>, vector<128x128xbf16>, vector<128x128xf32> -> vector<128x128xf32>
    %c0_4 = arith.constant 0 : index
    %c0_5 = arith.constant 0 : index
    %6 = vector.load %arg6[%c0_4, %c0_5] : memref<1x128xf32, #tpu.memory_space<vmem>>, vector<1x128xf32>
    %7 = vector.broadcast %6 : vector<1x128xf32> to vector<128x128xf32>
    %8 = arith.addf %5, %7 : vector<128x128xf32>
    %cst_6 = arith.constant 5.000000e-01 : f32
    %9 = vector.broadcast %cst_6 : f32 to vector<128x128xf32>
    %10 = arith.mulf %9, %8 : vector<128x128xf32>
    %cst_7 = arith.constant 0.707106769 : f32
    %11 = vector.broadcast %cst_7 : f32 to vector<128x128xf32>
    %12 = arith.mulf %8, %11 : vector<128x128xf32>
    %13 = math.erf %12 : vector<128x128xf32>
    %cst_8 = arith.constant 1.000000e+00 : f32
    %14 = vector.broadcast %cst_8 : f32 to vector<128x128xf32>
    %15 = arith.addf %14, %13 : vector<128x128xf32>
    %16 = arith.mulf %10, %15 : vector<128x128xf32>
    %c0_9 = arith.constant 0 : index
    %c0_10 = arith.constant 0 : index
    %17 = vector.load %arg11[%c0_9, %c0_10] : memref<128x128xf32, #tpu.memory_space<vmem>>, vector<128x128xf32>
    %18 = arith.truncf %16 : vector<128x128xf32> to vector<128x128xbf16>
    %c0_11 = arith.constant 0 : index
    %c0_12 = arith.constant 0 : index
    %19 = vector.load %arg7[%c0_11, %c0_12] : memref<128x128xbf16, #tpu.memory_space<vmem>>, vector<128x128xbf16>
    %cst_13 = arith.constant dense<0.000000e+00> : vector<128x128xf32>
    %20 = tpu.matmul %18, %19, %cst_13 {dimension_numbers = #tpu.dot_dimension_numbers<[1], [0], [0], [1], [0, 0, 1, 1], [], []>} : vector<128x128xbf16>, vector<128x128xbf16>, vector<128x128xf32> -> vector<128x128xf32>
    %21 = arith.addf %17, %20 : vector<128x128xf32>
    %c0_14 = arith.constant 0 : index
    %c0_15 = arith.constant 0 : index
    %22 = vector.load %arg11[%c0_14, %c0_15] : memref<128x128xf32, #tpu.memory_space<vmem>>, vector<128x128xf32>
    tpu.vector_store %arg11[%c0_14, %c0_15], %21 {strides = array<i32>} : memref<128x128xf32, #tpu.memory_space<vmem>>, vector<128x128xf32>,
    %c1_i32 = arith.constant 1 : i32
    %23 = arith.cmpi eq, %arg1, %c1_i32 : i32
    %24 = arith.extui %23 : i1 to i32
    %c0_i32_16 = arith.constant 0 : i32
    %25 = arith.cmpi ne, %24, %c0_i32_16 : i32
    scf.if %25 {
      %c0_17 = arith.constant 0 : index
      %c0_18 = arith.constant 0 : index
      %26 = vector.load %arg11[%c0_17, %c0_18] : memref<128x128xf32, #tpu.memory_space<vmem>>, vector<128x128xf32>
      %c0_19 = arith.constant 0 : index
      %c0_20 = arith.constant 0 : index
      %27 = vector.load %arg8[%c0_19, %c0_20] : memref<1x128xf32, #tpu.memory_space<vmem>>, vector<1x128xf32>
      %28 = vector.broadcast %27 : vector<1x128xf32> to vector<128x128xf32>
      %29 = arith.addf %26, %28 : vector<128x128xf32>
      %c0_21 = arith.constant 0 : index
      %c0_22 = arith.constant 0 : index
      %30 = vector.load %arg9[%c0_21, %c0_22] : memref<128x128xf32, #tpu.memory_space<vmem>>, vector<128x128xf32>
      tpu.vector_store %arg9[%c0_21, %c0_22], %29 {strides = array<i32>} : memref<128x128xf32, #tpu.memory_space<vmem>>, vector<128x128xf32>,
    } else {
    }
    return
  }
  func.func @transform_0(%arg0: i32, %arg1: i32) -> (i32, i32) {
    %c0_i32 = arith.constant 0 : i32
    %c0_i32_0 = arith.constant 0 : i32
    return %arg0, %c0_i32 : i32, i32
  }
  func.func @transform_1(%arg0: i32, %arg1: i32) -> (i32, i32) {
    %c0_i32 = arith.constant 0 : i32
    %c0_i32_0 = arith.constant 0 : i32
    %c0_i32_1 = arith.constant 0 : i32
    return %c0_i32, %c0_i32_0 : i32, i32
  }
  func.func @transform_2(%arg0: i32, %arg1: i32) -> (i32, i32) {
    %c0_i32 = arith.constant 0 : i32
    %c0_i32_0 = arith.constant 0 : i32
    %c0_i32_1 = arith.constant 0 : i32
    return %c0_i32, %c0_i32_0 : i32, i32
  }
  func.func @transform_3(%arg0: i32, %arg1: i32) -> (i32, i32) {
    %c0_i32 = arith.constant 0 : i32
    %c0_i32_0 = arith.constant 0 : i32
    return %c0_i32, %arg1 : i32, i32
  }
  func.func @transform_4(%arg0: i32, %arg1: i32) -> (i32, i32) {
    %c0_i32 = arith.constant 0 : i32
    %c0_i32_0 = arith.constant 0 : i32
    return %c0_i32, %arg1 : i32, i32
  }
  func.func @transform_5(%arg0: i32, %arg1: i32) -> (i32, i32) {
    %c0_i32 = arith.constant 0 : i32
    %c0_i32_0 = arith.constant 0 : i32
    return %arg1, %c0_i32 : i32, i32
  }
  func.func @transform_6(%arg0: i32, %arg1: i32) -> (i32, i32) {
    %c0_i32 = arith.constant 0 : i32
    %c0_i32_0 = arith.constant 0 : i32
    %c0_i32_1 = arith.constant 0 : i32
    return %c0_i32, %c0_i32_0 : i32, i32
  }
  func.func @transform_7(%arg0: i32, %arg1: i32) -> (i32, i32) {
    %c0_i32 = arith.constant 0 : i32
    %c0_i32_0 = arith.constant 0 : i32
    return %arg0, %c0_i32 : i32, i32
  }
}

</mosaic_0001>

<bundles_post_ra>
// kernel: tpu_custom_call.1
= control target key start
LH: loop header
LB: loop body
LE: loop exit
PB: predicated region body
PF: predicated region fallthrough
CT: control target
= control target key end

     0   :  { %s2708_s0 = inlined_call_operand.hbm [shape: f32[260,128], index: 0, kind: input, shape index: {}]   ;;  %s2709_s1 = inlined_call_operand.vmem [shape: f32[1,128], index: 1, kind: input, shape index: {}]   ;;  %s2710_s2 = inlined_call_operand.vmem [shape: f32[1,128], index: 2, kind: input, shape index: {}]   ;;  %s2711_s3 = inlined_call_operand.hbm [shape: bf16[128,256], index: 3, kind: input, shape index: {}]   ;;  %s2712_s4 = inlined_call_operand.vmem [shape: f32[1,256], index: 4, kind: input, shape index: {}]   ;;  %s2713_s5 = inlined_call_operand.hbm [shape: bf16[256,128], index: 5, kind: input, shape index: {}]   ;;  %s2714_s6 = inlined_call_operand.vmem [shape: f32[1,128], index: 6, kind: input, shape index: {}]   ;;  %s2715_s7 = inlined_call_operand.hbm [shape: f32[260,128], index: 7, kind: output, shape index: {}]  }
   0x1   :  { %2726 = sst [smem:[#allocation23_spill]] %s2708_s0 }
   0x2   :  { %2727 = sst [smem:[#allocation24_spill]] %s2715_s7 }
   0x3   :  { %12 = vsyncpa [#allocation5], 0 }
   0x4   :  { %14 = vsyncpa [#allocation5 + $0x1], 0 }
   0x5   :  { %15 = vsyncpa [#allocation8], 0 }
   0x6   :  { %17 = vsyncpa [#allocation8 + $0x1], 0 }
   0x7   :  { %18 = vsyncpa [#allocation6], 0 }
   0x8   :  { %20 = vsyncpa [#allocation6 + $0x1], 0  ;;  %s2013_s24 = smov 0   ;;  %s2015_s25 = smov 0  }
   0x9   :  { %s2017_s26 = smov 0   ;;  %s2019_s27 = smov 0  }
   0xa   :  { %s2021_s28 = smov 0   ;;  %s2023_s29 = smov 0  }
   0xb   :  { %s2025_s30 = smov 0   ;;  %s2027_s8 = smov 0  }
   0xc   :  { %s2029_s9 = smov 0   ;;  %s2031_s10 = smov 0  }
   0xd   :  { %s2033_s11 = smov 0  }
   0xe LB: > { %2728 = sst [smem:[#allocation14_spill]] %s1931_s27  ;;  %s2069_s12 = sadd.s32 4294967295, %s1959_s11   ;;  %s1959_s11 = sphi %s2033_s11, %s26_s11   ;;  %s1955_s10 = sphi %s2031_s10, %s2758_s10   ;;  %s1951_s9 = sphi %s2029_s9, %s2765_s9   ;;  %s1947_s8 = sphi %s2027_s8, %s2756_s8   ;;  %s1943_s30 = sphi %s2025_s30, %s2764_s30   ;;  %s1939_s29 = sphi %s2023_s29, %s2755_s29   ;;  %s1935_s28 = sphi %s2021_s28, %s2763_s28   ;;  %s1931_s27 = sphi %s2019_s27, %s2762_s27   ;;  %s1927_s26 = sphi %s2017_s26, %s2761_s26   ;;  %s1923_s25 = sphi %s2015_s25, %s2760_s25   ;;  %s1919_s24 = sphi %s2013_s24, %s2759_s24  }
   0xf   : > { %2729 = sst [smem:[#allocation15_spill]] %s1939_s29  ;;  %s1412_s13 = sadd.s32 4294967294, %s1959_s11  }
  0x10   : > { %2730 = sst [smem:[#allocation16_spill]] %s1947_s8  ;;  %s35_s14 = sadd.s32 1, %s1951_s9 }
  0x11   : > { %2731 = sst [smem:[#allocation17_spill]] %s1955_s10  ;;  %s38_s15 = sadd.s32 1, %s1955_s10 }
  0x12   : > { %p36_p0 = scmp.ge.s32.totalorder %s35_s14, 2  ;;  %s45_s16 = sadd.s32 1, %s1939_s29 }
  0x13   : > { %p52_p1 = scmp.ne.s32.totalorder %s1939_s29, %s1935_s28  ;;  %p53_p2 = scmp.eq.s32.totalorder %s1959_s11, 0 }
  0x14   : > { %s2767_s14 = smov (%p36_p0, %s35_s14), 0  ;;  %s2769_s15 = smov (!%p36_p0, %s38_s15), %s1955_s10 }
  0x15   : > { %2732 = sst [smem:[#allocation18_spill]] %s2767_s14  ;;  %p2086_p3 = por %p53_p2, %p52_p1 }
  0x16   : > { %p2718_p4 = scmp.ne.s32.totalorder %s1935_s28, %s1931_s27  ;;  %p40_p5 = scmp.ge.s32.totalorder %s2769_s15, 3 }
  0x17   : > { %p59_p6 = scmp.eq.s32.totalorder %s2069_s12, 0  ;;  %s110_s18 = ssub.s32 %s1951_s9, %s2767_s14 }
  0x18   : > { %s113_s19 = sadd.s32 1, %s1927_s26  ;;  %s2771_s15 = smov (%p40_p5, %s2769_s15), 0 }
  0x19   : > { %2734 = sst [smem:[#allocation19_spill]] %s2771_s15  ;;  %p2103_p7 = por %p59_p6, %p2718_p4 }
  0x1a   : > { %p111_p8 = scmp.eq.s32.totalorder %s110_s18, 0  ;;  %s42_s21 = ssub.s32 %s1955_s10, %s2771_s15 }
  0x1b   : > { %p120_p9 = scmp.ne.s32.totalorder %s1927_s26, %s1923_s25  ;;  %p43_p10 = scmp.eq.s32.totalorder %s42_s21, 0 }
  0x1c   : > { %p126_p11 = scmp.ne.s32.totalorder %s1923_s25, %s1919_s24  ;;  %p223_p0 = scmp.eq.s32.totalorder %s2069_s12, 5 }
  0x1d   : > { %s2114_s22 = scalar_select %p111_p8, %s1927_s26, %s113_s19  }
  0x1e   : > { %s2117_s23 = scalar_select %p43_p10, %s1939_s29, %s45_s16  }
  0x1f   : > { %2736 = sst [smem:[#allocation20_spill]] %s2114_s22  ;;  %p2121_p12 = por %p120_p9, %p53_p2 }
  0x20   : > { %2737 = sst [smem:[#allocation21_spill]] %s2117_s23  ;;  %p2127_p13 = por %p126_p11, %p59_p6 }
  0x21   : > { %p229_p5 = scmp.eq.s32.totalorder %s1412_s13, 5  ;;  %p2135_p4 = por %p223_p0, %p52_p1 }
  0x22   : > { %s2739_s7 = scalar_select %p2127_p13, 1, 0 }
  0x23   : > { %s2740_s18 = scalar_select %p2135_p4, 1, 0 }
  0x24   : > { %p2741_p8 = scmp.ne.s32.totalorder %s1935_s28, %s1931_s27  ;;  %p1414_p2 = scmp.ge.s32.totalorder %s1959_s11, 6 }
  0x26   : > { %p2142_p10 = por %p229_p5, %p2741_p8  ;;  %254 = sbr.rel (%p1414_p2) target bundleno = 136 (0x88), region = 28 }
  0x28   : > { %s2742_s24 = scalar_select %p2142_p10, 1, 0 }
  0x2a   : > { %2743 = sst [smem:[#allocation22_spill]] %s2742_s24 }
  0x2d   : > { %257 = sbr.rel (!%p2086_p3) target bundleno = 85 (0x55), region = 32  ;;  %s258_s16 = sand.u32 (%p2086_p3), 1, %s1939_s29  }
  0x2e   : > { %s1416_s13 = sshll.u32 (%p2086_p3), %s1955_s10, 4  ;;  %s1415_s19 = sshll.u32 (%p2086_p3), %s258_s16, 7 }
  0x2f   : > { %s264_s21 = ssub.s32 (%p2086_p3), 33, %s1416_s13  ;;  %s2154_s22 = scalar_lea.sflag (%p2086_p3), [#allocation5], %s258_s16 }
  0x30   : > { %p265_p1 = scmp.lt.s32.totalorder (%p2086_p3), %s264_s21, 16  ;;  %s262_s24 = scalar_lea.vmem (%p2086_p3), [#allocation4], %s1415_s19 }
  0x34   : > { %s2773_s21 = smov (!%p265_p1, %s264_s21), 16 }
  0x35   : > { %s2151_s15 = sshll.u32 %s2773_s21, 7 }
  0x36   : > { %s269_s23 = ssub.s32 2048, %s2151_s15 }
  0x37   : > { %270 = vsyncadd %s2154_s22, %s269_s23  ;;  %p1418_p3 = scmp.ne.s32.totalorder %s2151_s15, 0  ;;  %s1463_s17 = sshll.u32 %s1955_s10, 11 }
  0x38   : > { %s2744_s0 = sld [smem:[#allocation23_spill]]  ;;  %s275_s16 = sshll.u32 %s262_s24, 4  ;;  %s2164_s16 = int_to_ptr.vmem [resolvable:$true] %s275_s16 }
  0x3e   : > { %s2162_s13 = scalar_lea.hbm %s2744_s0, %s1463_s17  ;;  %s1753_s10 = scalar_lea.hbm %s2744_s0, 4224 }
  0x3f   : > { %s1749_s19 = scalar_lea.hbm %s2162_s13, %s2151_s15  ;;  %p1754_p0 = scmp.lt.u32.totalorder %s2162_s13, %s2744_s0 }
  0x40   : > { %p1750_p6 = scmp.ne.s32.totalorder %s2162_s13, %s1749_s19  ;;  %p1755_p5 = scmp.lt.u32.totalorder %s1753_s10, %s1749_s19 }
  0x41   : > { %p1757_p2 = scmp.lt.u32.totalorder %s1749_s19, %s2162_s13 }
  0x42   : > { %p1751_p9 = pnand %p1750_p6, %p1418_p3  ;;  %p1756_p8 = por %p1755_p5, %p1754_p0 }
  0x44   : > { %p1752_p11 = pneg %p1751_p9  ;;  %p1758_p1 = por %p1757_p2, %p1756_p8 }
  0x46   : > { %p1759_p10 = pnand %p1758_p1, %p1752_p11 }
  0x48   : > { %1762 = shalt.err (!%p1759_p10)
}
  0x49   : > { %s1763_s29 = scalar_lea.vmem %s2164_s16, %s2151_s15  ;;  %s1961_s24 = smov [#allocation4]  }
  0x4a   : > { %p1764_p6 = scmp.ne.s32.totalorder %s2164_s16, %s1763_s29  ;;  %s1767_s17 = sshll.u32 %s1961_s24, 4  ;;  %s1768_s17 = int_to_ptr.vmem [resolvable:$false] %s1767_s17 }
  0x4b   : > { %s1769_s8 = scalar_lea.vmem %s1768_s17, 4096  ;;  %p1770_p13 = scmp.lt.s32.totalorder %s2164_s16, %s1768_s17 }
  0x4c   : > { %p1765_p9 = pnand %p1764_p6, %p1418_p3  ;;  %p1771_p0 = scmp.lt.s32.totalorder %s1769_s8, %s1763_s29 }
  0x4e   : > { %p1766_p4 = pneg %p1765_p9  ;;  %p1772_p5 = por %p1771_p0, %p1770_p13 }
  0x50   : > { %p1773_p8 = pnand %p1772_p5, %p1766_p4 }
  0x52   : > { %1776 = shalt.err (!%p1773_p8)
}
  0x53   : > { %s1962_s10 = smov 128   ;;  %s1963_s19 = smov 8  }
  0x54   : > { %281 = dma.hbm_to_vmem [thread:$0]  (%p1418_p3), %s2162_s13, %s2151_s15, %s2164_s16, %s2154_s22, %s1962_s10, %s1962_s10, %s1963_s19  }
  0x55 PF: > { %s285_s23 = sand.u32 1, %s1959_s11   ;;  %s287_s21 = sand.u32 1, %s1927_s26  }
  0x56   : > { %s2193_s27 = sshll.u32 %s287_s21, 6  ;;  %s1423_s29 = sshll.u32 %s1951_s9, 6 }
  0x57   : > { %s2199_s8 = scalar_lea.hbm %s2711_s3, %s1423_s29  ;;  %s289_s15 = scalar_lea.vmem [#allocation7], %s2193_s27 }
  0x58   : > { %s295_s22 = sshll.u32 %s289_s15, 4  ;;  %s2204_s13 = scalar_lea.sflag [#allocation8], %s285_s23  ;;  %s2202_s22 = int_to_ptr.vmem [resolvable:$true] %s295_s22 }
  0x59   : > { %s1777_s16 = scalar_lea.hbm %s2199_s8, 1024  ;;  %s1781_s21 = scalar_lea.hbm %s2711_s3, 2048 }
  0x5a   : > { %p1778_p4 = scmp.ne.s32.totalorder %s2199_s8, %s1777_s16  ;;  %p1782_p3 = scmp.lt.u32.totalorder %s2199_s8, %s2711_s3 }
  0x5b   : > { %p1783_p11 = scmp.lt.u32.totalorder %s1781_s21, %s1777_s16  ;;  %p1785_p1 = scmp.lt.u32.totalorder %s1777_s16, %s2199_s8 }
  0x5c   : > { %p1779_p13 = pnand %p1778_p4, %p2121_p12 }
  0x5d   : > { %p1784_p2 = por %p1783_p11, %p1782_p3 }
  0x5e   : > { %p1780_p10 = pneg %p1779_p13 }
  0x5f   : > { %p1786_p6 = por %p1785_p1, %p1784_p2 }
  0x61   : > { %p1787_p9 = pnand %p1786_p6, %p1780_p10 }
  0x63   : > { %1790 = shalt.err (!%p1787_p9)
}
  0x64   : > { %s1791_s23 = scalar_lea.vmem %s2202_s22, 1024  ;;  %s1964_s17 = smov [#allocation7]  }
  0x65   : > { %p1792_p0 = scmp.ne.s32.totalorder %s2202_s22, %s1791_s23  ;;  %s1795_s15 = sshll.u32 %s1964_s17, 4  ;;  %s1796_s15 = int_to_ptr.vmem [resolvable:$false] %s1795_s15 }
  0x66   : > { %s1797_s10 = scalar_lea.vmem %s1796_s15, 2048  ;;  %p1798_p4 = scmp.lt.s32.totalorder %s2202_s22, %s1796_s15 }
  0x67   : > { %p1793_p5 = pnand %p1792_p0, %p2121_p12  ;;  %p1799_p13 = scmp.lt.s32.totalorder %s1797_s10, %s1791_s23 }
  0x69   : > { %p1794_p8 = pneg %p1793_p5  ;;  %p1800_p3 = por %p1799_p13, %p1798_p4 }
  0x6b   : > { %p1801_p11 = pnand %p1800_p3, %p1794_p8 }
  0x6d   : > { %1804 = shalt.err (!%p1801_p11)
}
  0x6e   : > { %s1965_s16 = smov 128   ;;  %s1966_s19 = smov 64  }
  0x6f   : > { %s1967_s21 = smov 4   ;;  %s1464_s29 = sshll.u32 %s1951_s9, 10 }
  0x70   : > { %1562 = dma.hbm_to_vmem [thread:$0]  (%p2121_p12), %s2199_s8, 1024, %s2202_s22, %s2204_s13, %s1965_s16, %s1966_s19, %s1967_s21  }
  0x71   : > { %s2234_s17 = scalar_lea.hbm %s2713_s5, %s1464_s29  ;;  %s315_s15 = scalar_lea.vmem [#allocation9], %s2193_s27 }
  0x72   : > { %s322_s10 = sshll.u32 %s315_s15, 4  ;;  %s1805_s0 = scalar_lea.hbm %s2234_s17, 1024  ;;  %s2237_s10 = int_to_ptr.vmem [resolvable:$true] %s322_s10 }
  0x73   : > { %p1806_p10 = scmp.ne.s32.totalorder %s2234_s17, %s1805_s0  ;;  %s1809_s16 = scalar_lea.hbm %s2713_s5, 2048 }
  0x74   : > { %p1810_p6 = scmp.lt.u32.totalorder %s2234_s17, %s2713_s5  ;;  %p1811_p9 = scmp.lt.u32.totalorder %s1809_s16, %s1805_s0 }
  0x75   : > { %p1807_p2 = pnand %p1806_p10, %p2121_p12  ;;  %p1813_p5 = scmp.lt.u32.totalorder %s1805_s0, %s2234_s17 }
  0x76   : > { %p1812_p0 = por %p1811_p9, %p1810_p6 }
  0x77   : > { %p1808_p1 = pneg %p1807_p2 }
  0x78   : > { %p1814_p8 = por %p1813_p5, %p1812_p0 }
  0x7a   : > { %p1815_p4 = pnand %p1814_p8, %p1808_p1 }
  0x7c   : > { %1818 = shalt.err (!%p1815_p4)
}
  0x7d   : > { %s1819_s27 = scalar_lea.vmem %s2237_s10, 1024  ;;  %s1968_s23 = smov [#allocation9]  }
  0x7e   : > { %p1820_p13 = scmp.ne.s32.totalorder %s2237_s10, %s1819_s27  ;;  %s1823_s15 = sshll.u32 %s1968_s23, 4  ;;  %s1824_s15 = int_to_ptr.vmem [resolvable:$false] %s1823_s15 }
  0x7f   : > { %s1825_s8 = scalar_lea.vmem %s1824_s15, 2048  ;;  %p1826_p10 = scmp.lt.s32.totalorder %s2237_s10, %s1824_s15 }
  0x80   : > { %p1821_p3 = pnand %p1820_p13, %p2121_p12  ;;  %p1827_p2 = scmp.lt.s32.totalorder %s1825_s8, %s1819_s27 }
  0x82   : > { %p1822_p11 = pneg %p1821_p3  ;;  %p1828_p6 = por %p1827_p2, %p1826_p10 }
  0x84   : > { %p1829_p9 = pnand %p1828_p6, %p1822_p11 }
  0x86   : > { %1832 = shalt.err (!%p1829_p9)
}
  0x87   : > { %1563 = dma.hbm_to_vmem [thread:$0]  (%p2121_p12), %s2234_s17, 1024, %s2237_s10, %s2204_s13, %s1966_s19, %s1966_s19, %s1967_s21  }
  0x88 PF: > { %p1427_p1 = scmp.ge.s32.totalorder %s1959_s11, 1  ;;  %p330_p0 = scmp.lt.s32.totalorder %s1959_s11, 7 }
  0x8a   : > { %p331_p5 = pnand %p1427_p1, %p330_p0 }
  0x8b   : > { %s2267_s0 = sand.u32 (!%p331_p5), 1, %s1935_s28  }
  0x8c   : > { %334 = sbr.rel (%p331_p5) target bundleno = 948 (0x3b4), region = 48  ;;  %s1428_s14 = sshll.u32 (!%p331_p5), %s2267_s0, 7 }
  0x8d   : > { %s337_s22 = scalar_lea.sflag (!%p331_p5), [#allocation5], %s2267_s0  ;;  %s2271_s16 = scalar_lea.vmem (!%p331_p5), [#allocation4], %s1428_s14 }
  0x93   : > { %1906 = dma.done.wait (%p2103_p7), %s337_s22, 2048  }
  0x94   : > { %1908 = vsyncadd (%p2103_p7), %s337_s22, 4294965248  ;;  %s345_s13 = sand.u32 1, %s2069_s12   ;;  %s347_s19 = sand.u32 1, %s1923_s25  }
  0x95   : > { %s1429_s21 = sshll.u32 %s347_s19, 6  ;;  %s346_s17 = scalar_lea.sflag [#allocation8], %s345_s13 }
  0x96   : > { %s2279_s10 = scalar_lea.vmem [#allocation7], %s1429_s21  ;;  %p2745_p12 = scmp.ne.s32.totalorder %s2739_s7, 0 }
  0x98   : > { %1910 = dma.done.wait (%p2745_p12), %s346_s17, 2048  }
  0x99   : > { %1912 = vsyncadd (%p2745_p12), %s346_s17, 4294965248  ;;  %p407_p8 = scmp.lt.s32.totalorder %s1943_s30, 1  ;;  %s2293_s27 = scalar_lea.vmem [#allocation9], %s1429_s21 }
  0x9a   : > { %s2295_s23 = scalar_lea.vmem [#allocation10], %s1428_s14  ;;  %p1432_p7 = scmp.ne.s32.totalorder %s1943_s30, 0 }
  0x9b   : > { %s2287_s24 = scalar_select %p407_p8, %s1943_s30, 1 }
  0x9c   : > { %420 = sbr.rel (%p1432_p7) target bundleno = 386 (0x182), region = 64  ;;  %v2299_v0 = vld [vmem:[%s2271_s16 + $0x10] sm:$0xff] (!%p1432_p7)  ;;  %v2302_v1 = vld [vmem:[%s2271_s16] sm:$0xff] (!%p1432_p7)  ;;  %v2307_v2 = vld [vmem:[%s2271_s16 + $0x18] sm:$0xff] (!%p1432_p7)  ;;  %v1969_v32 = vmov (!%p1432_p7), 0.0  }
  0x9d   : > { %s409_s12 = scalar_lea.vmem %s2712_s4, %s2287_s24  ;;  %441 = vadd.xlane.f32.xlu1 (!%p1432_p7), %v2299_v0  ;;  %437 = vadd.xlane.f32.xlu0 (!%p1432_p7), %v2302_v1  ;;  %v2310_v3 = vld [vmem:[%s2271_s16 + $0x8] sm:$0xff] (!%p1432_p7)  ;;  %v2318_v5 = vld [vmem:[%s2271_s16 + $0x20] sm:$0xff] (!%p1432_p7)  ;;  %v2323_v6 = vld [vmem:[%s2271_s16 + $0x38] sm:$0xff] (!%p1432_p7)  ;;  %v485_v17 = vmul.f32 (!%p1432_p7), %v2302_v1, %v2302_v1  ;;  %v488_v18 = vmul.f32 (!%p1432_p7), %v2307_v2, %v2307_v2  ;;  %v487_v19 = vmul.f32 (!%p1432_p7), %v2299_v0, %v2299_v0 }
  0x9e   : > { %v2315_v4 = vld [vmem:[%s2271_s16 + $0x28] sm:$0xff] (!%p1432_p7)  ;;  %v2326_v7 = vld [vmem:[%s2271_s16 + $0x30] sm:$0xff] (!%p1432_p7)  ;;  %v2334_v9 = vld [vmem:[%s2271_s16 + $0x40] sm:$0xff] (!%p1432_p7)  ;;  %v486_v16 = vmul.f32 (!%p1432_p7), %v2310_v3, %v2310_v3  ;;  %v489_v21 = vmul.f32 (!%p1432_p7), %v2318_v5, %v2318_v5  ;;  %v492_v22 = vmul.f32 (!%p1432_p7), %v2323_v6, %v2323_v6  ;;  %707 = vst [vmem:[#allocation3] sm:$0xff] (!%p1432_p7), %v1969_v32 }
  0x9f   : > { %v2331_v8 = vld [vmem:[%s2271_s16 + $0x48] sm:$0xff] (!%p1432_p7)  ;;  %v2339_v10 = vld [vmem:[%s2271_s16 + $0x58] sm:$0xff] (!%p1432_p7)  ;;  %v2342_v11 = vld [vmem:[%s2271_s16 + $0x50] sm:$0xff] (!%p1432_p7)  ;;  %v490_v20 = vmul.f32 (!%p1432_p7), %v2315_v4, %v2315_v4  ;;  %v491_v23 = vmul.f32 (!%p1432_p7), %v2326_v7, %v2326_v7  ;;  %v493_v25 = vmul.f32 (!%p1432_p7), %v2334_v9, %v2334_v9  ;;  %708 = vst [vmem:[#allocation3 + $0x8] sm:$0xff] (!%p1432_p7), %v1969_v32 }
  0xa0   : > { %v2347_v12 = vld [vmem:[%s2271_s16 + $0x68] sm:$0xff] (!%p1432_p7)  ;;  %v2350_v13 = vld [vmem:[%s2271_s16 + $0x60] sm:$0xff] (!%p1432_p7)  ;;  %v2355_v14 = vld [vmem:[%s2271_s16 + $0x78] sm:$0xff] (!%p1432_p7)  ;;  %v494_v24 = vmul.f32 (!%p1432_p7), %v2331_v8, %v2331_v8  ;;  %v496_v26 = vmul.f32 (!%p1432_p7), %v2339_v10, %v2339_v10  ;;  %v495_v27 = vmul.f32 (!%p1432_p7), %v2342_v11, %v2342_v11  ;;  %709 = vst [vmem:[#allocation3 + $0x10] sm:$0xff] (!%p1432_p7), %v1969_v32 }
  0xa1   : > { %443 = vadd.xlane.f32.xlu1 (!%p1432_p7), %v2307_v2  ;;  %439 = vadd.xlane.f32.xlu0 (!%p1432_p7), %v2310_v3  ;;  %v2358_v15 = vld [vmem:[%s2271_s16 + $0x70] sm:$0xff] (!%p1432_p7)  ;;  %v498_v28 = vmul.f32 (!%p1432_p7), %v2347_v12, %v2347_v12  ;;  %v497_v29 = vmul.f32 (!%p1432_p7), %v2350_v13, %v2350_v13  ;;  %v500_v30 = vmul.f32 (!%p1432_p7), %v2355_v14, %v2355_v14 }
  0xa2   : > { %v499_v31 = vmul.f32 (!%p1432_p7), %v2358_v15, %v2358_v15  ;;  %710 = vst [vmem:[#allocation3 + $0x18] sm:$0xff] (!%p1432_p7), %v1969_v32  ;;  %711 = vst [vmem:[#allocation3 + $0x20] sm:$0xff] (!%p1432_p7), %v1969_v32 }
  0xa3   : > { %712 = vst [vmem:[#allocation3 + $0x28] sm:$0xff] %v1969_v32  ;;  %713 = vst [vmem:[#allocation3 + $0x30] sm:$0xff] %v1969_v32 }
  0xa4   : > { %714 = vst [vmem:[#allocation3 + $0x38] sm:$0xff] %v1969_v32  ;;  %715 = vst [vmem:[#allocation3 + $0x40] sm:$0xff] %v1969_v32 }
  0xa5   : > { %447 = vadd.xlane.f32.xlu1 %v2315_v4  ;;  %445 = vadd.xlane.f32.xlu0 %v2318_v5  ;;  %716 = vst [vmem:[#allocation3 + $0x48] sm:$0xff] %v1969_v32  ;;  %717 = vst [vmem:[#allocation3 + $0x50] sm:$0xff] %v1969_v32 }
  0xa6   : > { %718 = vst [vmem:[#allocation3 + $0x58] sm:$0xff] %v1969_v32  ;;  %719 = vst [vmem:[#allocation3 + $0x60] sm:$0xff] %v1969_v32 }
  0xa7   : > { %720 = vst [vmem:[#allocation3 + $0x68] sm:$0xff] %v1969_v32  ;;  %721 = vst [vmem:[#allocation3 + $0x70] sm:$0xff] %v1969_v32 }
  0xa8   : > { %722 = vst [vmem:[#allocation3 + $0x78] sm:$0xff] %v1969_v32 }
  0xa9   : > { %451 = vadd.xlane.f32.xlu1 %v2323_v6  ;;  %449 = vadd.xlane.f32.xlu0 %v2326_v7 }
  0xad   : > { %455 = vadd.xlane.f32.xlu1 %v2331_v8  ;;  %453 = vadd.xlane.f32.xlu0 %v2334_v9 }
  0xb1   : > { %459 = vadd.xlane.f32.xlu1 %v2339_v10  ;;  %457 = vadd.xlane.f32.xlu0 %v2342_v11 }
  0xb5   : > { %463 = vadd.xlane.f32.xlu1 %v2347_v12  ;;  %461 = vadd.xlane.f32.xlu0 %v2350_v13 }
  0xb9   : > { %467 = vadd.xlane.f32.xlu1 %v2355_v14  ;;  %465 = vadd.xlane.f32.xlu0 %v2358_v15 }
  0xbd   : > { %503 = vadd.xlane.f32.xlu1 %v486_v16  ;;  %501 = vadd.xlane.f32.xlu0 %v485_v17 }
  0xc1   : > { %507 = vadd.xlane.f32.xlu1 %v488_v18  ;;  %505 = vadd.xlane.f32.xlu0 %v487_v19 }
  0xc5   : > { %511 = vadd.xlane.f32.xlu1 %v490_v20  ;;  %509 = vadd.xlane.f32.xlu0 %v489_v21 }
  0xc9   : > { %515 = vadd.xlane.f32.xlu1 %v492_v22  ;;  %513 = vadd.xlane.f32.xlu0 %v491_v23 }
  0xcd   : > { %519 = vadd.xlane.f32.xlu1 %v494_v24  ;;  %517 = vadd.xlane.f32.xlu0 %v493_v25 }
  0xd1   : > { %523 = vadd.xlane.f32.xlu1 %v496_v26  ;;  %521 = vadd.xlane.f32.xlu0 %v495_v27 }
  0xd5   : > { %527 = vadd.xlane.f32.xlu1 %v498_v28  ;;  %525 = vadd.xlane.f32.xlu0 %v497_v29 }
  0xd9   : > { %531 = vadd.xlane.f32.xlu1 %v500_v30  ;;  %529 = vadd.xlane.f32.xlu0 %v499_v31 }
 0x12a   : > { %v442_v33 = vpop.xlane.xlu1 %441  ;;  %v438_v34 = vpop.xlane.xlu0 %437 }
 0x12b   : > { %v2402_v49 = vmul.f32 0.0078125, %v438_v34  ;;  %v2406_v51 = vmul.f32 0.0078125, %v442_v33 }
 0x12d   : > { %v549_v55 = vmul.f32 %v2402_v49, %v2402_v49  ;;  %v551_v61 = vmul.f32 %v2406_v51, %v2406_v51  ;;  %v583_v23 = vsub.f32 %v2299_v0, %v2406_v51  ;;  %v581_v24 = vsub.f32 %v2302_v1, %v2402_v49 }
 0x12e   : > { %v444_v35 = vpop.xlane.xlu1 %443  ;;  %v440_v36 = vpop.xlane.xlu0 %439 }
 0x12f   : > { %v2404_v50 = vmul.f32 0.0078125, %v440_v36  ;;  %v2408_v52 = vmul.f32 0.0078125, %v444_v35 }
 0x131   : > { %v550_v56 = vmul.f32 %v2404_v50, %v2404_v50  ;;  %v552_v62 = vmul.f32 %v2408_v52, %v2408_v52  ;;  %v584_v36 = vsub.f32 %v2307_v2, %v2408_v52 }
 0x132   : > { %v448_v37 = vpop.xlane.xlu1 %447  ;;  %v446_v38 = vpop.xlane.xlu0 %445 }
 0x133   : > { %v2418_v63 = vmul.f32 0.0078125, %v448_v37  ;;  %v2420_v16 = vmul.f32 0.0078125, %v446_v38  ;;  %v582_v37 = vsub.f32 %v2310_v3, %v2404_v50 }
 0x135   : > { %v554_v28 = vmul.f32 %v2418_v63, %v2418_v63  ;;  %v553_v29 = vmul.f32 %v2420_v16, %v2420_v16  ;;  %v586_v38 = vsub.f32 %v2315_v4, %v2418_v63 }
 0x136   : > { %v452_v39 = vpop.xlane.xlu1 %451  ;;  %v450_v40 = vpop.xlane.xlu0 %449 }
 0x137   : > { %v2426_v25 = vmul.f32 0.0078125, %v452_v39  ;;  %v2432_v30 = vmul.f32 0.0078125, %v450_v40  ;;  %v585_v39 = vsub.f32 %v2318_v5, %v2420_v16 }
 0x139   : > { %v556_v40 = vmul.f32 %v2426_v25, %v2426_v25 }
 0x13a   : > { %v456_v41 = vpop.xlane.xlu1 %455  ;;  %v454_v42 = vpop.xlane.xlu0 %453 }
 0x13b   : > { %v2448_v2 = vmul.f32 0.0078125, %v454_v42 }
 0x13e   : > { %v2394_v43 = vpop.xlane.xlu1 %459  ;;  %v458_v44 = vpop.xlane.xlu0 %457 }
 0x142   : > { %v464_v45 = vpop.xlane.xlu1 %463  ;;  %v2396_v46 = vpop.xlane.xlu0 %461 }
 0x146   : > { %v2398_v47 = vpop.xlane.xlu1 %467  ;;  %v2400_v48 = vpop.xlane.xlu0 %465 }
 0x14a   : > { %v504_v53 = vpop.xlane.xlu1 %503  ;;  %v502_v54 = vpop.xlane.xlu0 %501 }
 0x14b   : > { %v534_v57 = vmul.f32 0.0078125, %v504_v53  ;;  %v533_v58 = vmul.f32 0.0078125, %v502_v54  ;;  %v555_v54 = vmul.f32 %v2432_v30, %v2432_v30 }
 0x14d   : > { %v566_v59 = vsub.f32 %v534_v57, %v550_v56  ;;  %v565_v60 = vsub.f32 %v533_v58, %v549_v55  ;;  %v2446_v55 = vmul.f32 0.0078125, %v456_v41  ;;  %v587_v41 = vsub.f32 %v2326_v7, %v2432_v30 }
 0x14e   : > { %v508_v17 = vpop.xlane.xlu1 %507  ;;  %v506_v18 = vpop.xlane.xlu0 %505 }
 0x14f   : > { %v598_v19 = vadd.f32 256.0, %v566_v59  ;;  %v597_v20 = vadd.f32 256.0, %v565_v60  ;;  %v536_v21 = vmul.f32 0.0078125, %v508_v17  ;;  %v535_v22 = vmul.f32 0.0078125, %v506_v18 }
 0x150   : > { %v588_v59 = vsub.f32 %v2323_v6, %v2426_v25  ;;  %v2453_v60 = vmul.f32 0.0078125, %v2394_v43  ;;  %v558_v18 = vmul.f32 %v2446_v55, %v2446_v55  ;;  %v589_v25 = vsub.f32 %v2334_v9, %v2448_v2 }
 0x151   : > { %1669 = vrsqrt.f32 %v598_v19  ;;  %v568_v26 = vsub.f32 %v536_v21, %v552_v62  ;;  %v567_v27 = vsub.f32 %v535_v22, %v551_v61  ;;  %v2455_v61 = vmul.f32 0.0078125, %v458_v44  ;;  %v2471_v21 = vld [vmem:[%s2709_s1] ss:$0 sm:$0xff] }
 0x152   : > { %1671 = vrsqrt.f32 %v597_v20  ;;  %v512_v31 = vpop.xlane.xlu1 %511  ;;  %v510_v32 = vpop.xlane.xlu0 %509  ;;  %v2457_v62 = vmul.f32 0.0078125, %v464_v45  ;;  %v557_v19 = vmul.f32 %v2448_v2, %v2448_v2  ;;  %v2466_v20 = vmul.f32 0.0078125, %v2396_v46 }
 0x153   : > { %v600_v33 = vadd.f32 256.0, %v568_v26  ;;  %v599_v34 = vadd.f32 256.0, %v567_v27  ;;  %v538_v35 = vmul.f32 0.0078125, %v512_v31  ;;  %v537_v1 = vmul.f32 0.0078125, %v510_v32 }
 0x154   : > { %v560_v31 = vmul.f32 %v2453_v60, %v2453_v60  ;;  %v559_v46 = vmul.f32 %v2455_v61, %v2455_v61  ;;  %v562_v32 = vmul.f32 %v2457_v62, %v2457_v62  ;;  %v591_v2 = vsub.f32 %v2342_v11, %v2455_v61 }
 0x155   : > { %1673 = vrsqrt.f32 %v600_v33  ;;  %v570_v49 = vsub.f32 %v538_v35, %v554_v28  ;;  %v569_v53 = vsub.f32 %v537_v1, %v553_v29  ;;  %v593_v11 = vsub.f32 %v2350_v13, %v2466_v20 }
 0x156   : > { %1675 = vrsqrt.f32 %v599_v34  ;;  %v516_v3 = vpop.xlane.xlu1 %515  ;;  %v514_v50 = vpop.xlane.xlu0 %513  ;;  %v2482_v34 = vld [vmem:[%s2710_s2] ss:$0 sm:$0xff] }
 0x157   : > { %v602_v52 = vadd.f32 256.0, %v570_v49  ;;  %v601_v56 = vadd.f32 256.0, %v569_v53  ;;  %v540_v57 = vmul.f32 0.0078125, %v516_v3  ;;  %v539_v58 = vmul.f32 0.0078125, %v514_v50 }
 0x158   : > { %v561_v49 = vmul.f32 %v2466_v20, %v2466_v20  ;;  %v2487_v53 = vmul.f32 0.0078125, %v2398_v47 }
 0x159   : > { %1677 = vrsqrt.f32 %v602_v52  ;;  %v572_v42 = vsub.f32 %v540_v57, %v556_v40  ;;  %v571_v17 = vsub.f32 %v539_v58, %v555_v54 }
 0x15a   : > { %1679 = vrsqrt.f32 %v601_v56  ;;  %v520_v43 = vpop.xlane.xlu1 %519  ;;  %v518_v44 = vpop.xlane.xlu0 %517 }
 0x15b   : > { %v1670_v45 = vpop.eup %1669  ;;  %v604_v22 = vadd.f32 256.0, %v572_v42  ;;  %v603_v26 = vadd.f32 256.0, %v571_v17  ;;  %v542_v27 = vmul.f32 0.0078125, %v520_v43  ;;  %v541_v28 = vmul.f32 0.0078125, %v518_v44 }
 0x15c   : > { %v1672_v29 = vpop.eup %1671  ;;  %v630_v33 = vmul.f32 %v1670_v45, %v582_v37  ;;  %v2492_v42 = vmul.f32 0.0078125, %v2400_v48  ;;  %v564_v45 = vmul.f32 %v2487_v53, %v2487_v53 }
 0x15d   : > { %v629_v35 = vmul.f32 %v1672_v29, %v581_v24  ;;  %1681 = vrsqrt.f32 %v604_v22  ;;  %v574_v1 = vsub.f32 %v542_v27, %v558_v18  ;;  %v573_v40 = vsub.f32 %v541_v28, %v557_v19 }
 0x15e   : > { %v653_v54 = vmul.f32 %v2471_v21, %v630_v33  ;;  %1683 = vrsqrt.f32 %v603_v26  ;;  %v524_v3 = vpop.xlane.xlu1 %523  ;;  %v522_v37 = vpop.xlane.xlu0 %521  ;;  %v595_v13 = vsub.f32 %v2358_v15, %v2492_v42 }
 0x15f   : > { %v1674_v50 = vpop.eup %1673  ;;  %v652_v52 = vmul.f32 %v2471_v21, %v629_v35  ;;  %v606_v56 = vadd.f32 256.0, %v574_v1  ;;  %v605_v57 = vadd.f32 256.0, %v573_v40  ;;  %v544_v24 = vmul.f32 0.0078125, %v524_v3 }
 0x160   : > { %v1676_v58 = vpop.eup %1675  ;;  %v676_v17 = vadd.f32 %v2482_v34, %v653_v54  ;;  %v632_v18 = vmul.f32 %v1674_v50, %v584_v36  ;;  %v543_v47 = vmul.f32 0.0078125, %v522_v37  ;;  %v563_v3 = vmul.f32 %v2492_v42, %v2492_v42 }
 0x161   : > { %v675_v19 = vadd.f32 %v2482_v34, %v652_v52  ;;  %v631_v43 = vmul.f32 %v1676_v58, %v583_v23  ;;  %1685 = vrsqrt.f32 %v606_v56  ;;  %v576_v44 = vsub.f32 %v544_v24, %v560_v31 }
 0x162   : > { %v655_v22 = vmul.f32 %v2471_v21, %v632_v18  ;;  %1687 = vrsqrt.f32 %v605_v57  ;;  %v575_v48 = vsub.f32 %v543_v47, %v559_v46  ;;  %v528_v26 = vpop.xlane.xlu1 %527  ;;  %v526_v27 = vpop.xlane.xlu0 %525  ;;  %v590_v47 = vsub.f32 %v2331_v8, %v2446_v55 }
 0x163   : > { %v1678_v28 = vpop.eup %1677  ;;  %v691_v36 = vpack.c.bf16 %v676_v17, %v675_v19  ;;  %v654_v29 = vmul.f32 %v2471_v21, %v631_v43  ;;  %v608_v33 = vadd.f32 256.0, %v576_v44  ;;  %v546_v35 = vmul.f32 0.0078125, %v528_v26 }
 0x164   : > { %v1680_v1 = vpop.eup %1679  ;;  %v678_v0 = vadd.f32 %v2482_v34, %v655_v22  ;;  %v634_v51 = vmul.f32 %v1678_v28, %v586_v38  ;;  %v607_v23 = vadd.f32 256.0, %v575_v48  ;;  %v545_v31 = vmul.f32 0.0078125, %v526_v27 }
 0x165   : > { %699 = vst [vmem:[#allocation2] sm:$0xff] %v691_v36  ;;  %v677_v46 = vadd.f32 %v2482_v34, %v654_v29  ;;  %v633_v40 = vmul.f32 %v1680_v1, %v585_v39  ;;  %1689 = vrsqrt.f32 %v608_v33  ;;  %v578_v54 = vsub.f32 %v546_v35, %v562_v32 }
 0x166   : > { %v657_v37 = vmul.f32 %v2471_v21, %v634_v51  ;;  %1691 = vrsqrt.f32 %v607_v23  ;;  %v577_v50 = vsub.f32 %v545_v31, %v561_v49  ;;  %v532_v4 = vpop.xlane.xlu1 %531  ;;  %v530_v63 = vpop.xlane.xlu0 %529 }
 0x167   : > { %v1682_v38 = vpop.eup %1681  ;;  %v692_v52 = vpack.c.bf16 %v678_v0, %v677_v46  ;;  %v656_v56 = vmul.f32 %v2471_v21, %v633_v40  ;;  %v610_v57 = vadd.f32 256.0, %v578_v54  ;;  %v548_v24 = vmul.f32 0.0078125, %v532_v4 }
 0x168   : > { %v1684_v58 = vpop.eup %1683  ;;  %v680_v5 = vadd.f32 %v2482_v34, %v657_v37  ;;  %v636_v16 = vmul.f32 %v1682_v38, %v588_v59  ;;  %v609_v39 = vadd.f32 256.0, %v577_v50  ;;  %v547_v32 = vmul.f32 0.0078125, %v530_v63 }
 0x169   : > { %700 = vst [vmem:[#allocation2 + $0x8] sm:$0xff] %v692_v52  ;;  %v679_v49 = vadd.f32 %v2482_v34, %v656_v56  ;;  %v635_v17 = vmul.f32 %v1684_v58, %v587_v41  ;;  %1693 = vrsqrt.f32 %v610_v57  ;;  %v580_v18 = vsub.f32 %v548_v24, %v564_v45 }
 0x16a   : > { %v659_v19 = vmul.f32 %v2471_v21, %v636_v16  ;;  %1695 = vrsqrt.f32 %v609_v39  ;;  %v579_v43 = vsub.f32 %v547_v32, %v563_v3  ;;  %v592_v45 = vsub.f32 %v2339_v10, %v2453_v60 }
 0x16b   : > { %v1686_v6 = vpop.eup %1685  ;;  %v693_v59 = vpack.c.bf16 %v680_v5, %v679_v49  ;;  %v658_v44 = vmul.f32 %v2471_v21, %v635_v17  ;;  %v612_v22 = vadd.f32 256.0, %v580_v18  ;;  %v594_v10 = vsub.f32 %v2347_v12, %v2457_v62 }
 0x16c   : > { %v1688_v48 = vpop.eup %1687  ;;  %v682_v7 = vadd.f32 %v2482_v34, %v659_v19  ;;  %v638_v30 = vmul.f32 %v1686_v6, %v590_v47  ;;  %v611_v41 = vadd.f32 256.0, %v579_v43  ;;  %v596_v12 = vsub.f32 %v2355_v14, %v2487_v53 }
 0x16d   : > { %701 = vst [vmem:[#allocation2 + $0x10] sm:$0xff] %v693_v59  ;;  %v681_v8 = vadd.f32 %v2482_v34, %v658_v44  ;;  %v637_v55 = vmul.f32 %v1688_v48, %v589_v25  ;;  %1697 = vrsqrt.f32 %v612_v22 }
 0x16e   : > { %v661_v26 = vmul.f32 %v2471_v21, %v638_v30  ;;  %1699 = vrsqrt.f32 %v611_v41 }
 0x16f   : > { %v1690_v9 = vpop.eup %1689  ;;  %v694_v27 = vpack.c.bf16 %v682_v7, %v681_v8  ;;  %v660_v28 = vmul.f32 %v2471_v21, %v637_v55 }
 0x170   : > { %v1692_v36 = vpop.eup %1691  ;;  %v684_v29 = vadd.f32 %v2482_v34, %v661_v26  ;;  %v640_v33 = vmul.f32 %v1690_v9, %v592_v45 }
 0x171   : > { %702 = vst [vmem:[#allocation2 + $0x18] sm:$0xff] %v694_v27  ;;  %v683_v35 = vadd.f32 %v2482_v34, %v660_v28  ;;  %v639_v1 = vmul.f32 %v1692_v36, %v591_v2 }
 0x172   : > { %v663_v60 = vmul.f32 %v2471_v21, %v640_v33 }
 0x173   : > { %v1694_v0 = vpop.eup %1693  ;;  %v695_v61 = vpack.c.bf16 %v684_v29, %v683_v35  ;;  %v662_v51 = vmul.f32 %v2471_v21, %v639_v1 }
 0x174   : > { %v1696_v23 = vpop.eup %1695  ;;  %v686_v31 = vadd.f32 %v2482_v34, %v663_v60  ;;  %v642_v46 = vmul.f32 %v1694_v0, %v594_v10 }
 0x175   : > { %703 = vst [vmem:[#allocation2 + $0x20] sm:$0xff] %v695_v61  ;;  %v685_v40 = vadd.f32 %v2482_v34, %v662_v51  ;;  %v641_v54 = vmul.f32 %v1696_v23, %v593_v11 }
 0x176   : > { %v665_v62 = vmul.f32 %v2471_v21, %v642_v46 }
 0x177   : > { %v1698_v3 = vpop.eup %1697  ;;  %v696_v20 = vpack.c.bf16 %v686_v31, %v685_v40  ;;  %v664_v37 = vmul.f32 %v2471_v21, %v641_v54 }
 0x178   : > { %v1700_v50 = vpop.eup %1699  ;;  %v688_v4 = vadd.f32 %v2482_v34, %v665_v62  ;;  %v644_v63 = vmul.f32 %v1698_v3, %v596_v12 }
 0x179   : > { %704 = vst [vmem:[#allocation2 + $0x28] sm:$0xff] %v696_v20  ;;  %v687_v38 = vadd.f32 %v2482_v34, %v664_v37  ;;  %v643_v52 = vmul.f32 %v1700_v50, %v595_v13 }
 0x17a   : > { %v667_v56 = vmul.f32 %v2471_v21, %v644_v63 }
 0x17b   : > { %v697_v14 = vpack.c.bf16 %v688_v4, %v687_v38  ;;  %v666_v53 = vmul.f32 %v2471_v21, %v643_v52 }
 0x17c   : > { %v690_v57 = vadd.f32 %v2482_v34, %v667_v56 }
 0x17d   : > { %705 = vst [vmem:[#allocation2 + $0x30] sm:$0xff] %v697_v14  ;;  %v689_v15 = vadd.f32 %v2482_v34, %v666_v53 }
 0x17f   : > { %v698_v42 = vpack.c.bf16 %v690_v57, %v689_v15 }
 0x181   : > { %706 = vst [vmem:[#allocation2 + $0x38] sm:$0xff] %v698_v42 }
 0x182 PF: > { %v1701_v24 = vld [vmem:[%s2279_s10] sm:$0xff]   ;;  %v1702_v58 = vld [vmem:[%s2279_s10 + $0x8] sm:$0xff]   ;;  %v1703_v21 = vld [vmem:[%s2279_s10 + $0x10] sm:$0xff]   ;;  %p1452_p4 = scmp.ne.s32.totalorder %s1943_s30, 1 }
 0x183   : > { %1498 = vmatprep.subr.bf16.mxu0 %v1701_v24  ;;  %v1704_v34 = vld [vmem:[%s2279_s10 + $0x18] sm:$0xff]   ;;  %v723_v5 = vld [vmem:[#allocation2] sm:$0xff]  ;;  %v1710_v32 = vld [vmem:[%s2293_s27 + $0x8] sm:$0xff]  }
 0x184   : > { %1499 = vmatpush3.bf16.msra.mxu0 %v1701_v24  ;;  %1514 = vmatprep.mubr.bf16.mxu0 %v723_v5  ;;  %v1705_v16 = vld [vmem:[%s2279_s10 + $0x20] sm:$0xff]   ;;  %v1706_v49 = vld [vmem:[%s2279_s10 + $0x28] sm:$0xff]   ;;  %v1707_v17 = vld [vmem:[%s2279_s10 + $0x30] sm:$0xff]  }
 0x185   : > { %1500 = vmatprep.subr.bf16.mxu0 %v1702_v58  ;;  %v1709_v39 = vld [vmem:[%s2293_s27] sm:$0xff]   ;;  %v1708_v18 = vld [vmem:[%s2279_s10 + $0x38] sm:$0xff]   ;;  %v724_v47 = vld [vmem:[#allocation2 + $0x8] sm:$0xff] }
 0x186   : > { %1530 = vmatprep.subr.bf16.mxu1 %v1709_v39  ;;  %v725_v19 = vld [vmem:[#allocation2 + $0x10] sm:$0xff]  ;;  %v726_v43 = vld [vmem:[#allocation2 + $0x18] sm:$0xff]  ;;  %v727_v6 = vld [vmem:[#allocation2 + $0x20] sm:$0xff] }
 0x187   : > { %1531 = vmatpush3.bf16.msra.mxu1 %v1709_v39  ;;  %v728_v25 = vld [vmem:[#allocation2 + $0x28] sm:$0xff]  ;;  %v729_v59 = vld [vmem:[#allocation2 + $0x30] sm:$0xff]  ;;  %v1712_v48 = vld [vmem:[%s2293_s27 + $0x18] sm:$0xff]  }
 0x188   : > { %1501 = vmatpush3.bf16.msra.mxu0 %v1702_v58  ;;  %1532 = vmatprep.subr.bf16.mxu1 %v1710_v32  ;;  %v730_v44 = vld [vmem:[#allocation2 + $0x38] sm:$0xff]  ;;  %v1711_v22 = vld [vmem:[%s2293_s27 + $0x10] sm:$0xff]   ;;  %v1713_v7 = vld [vmem:[%s2293_s27 + $0x20] sm:$0xff]  }
 0x189   : > { %1502 = vmatprep.subr.bf16.mxu0 %v1703_v21  ;;  %v1714_v30 = vld [vmem:[%s2293_s27 + $0x28] sm:$0xff]   ;;  %v1715_v41 = vld [vmem:[%s2293_s27 + $0x30] sm:$0xff]   ;;  %v1716_v8 = vld [vmem:[%s2293_s27 + $0x38] sm:$0xff]  }
 0x18a   : > { %v2580_v55 = vld [vmem:[%s409_s12] ss:$0 sm:$0xff] }
 0x18b   : > { %1533 = vmatpush3.bf16.msra.mxu1 %v1710_v32 }
 0x18c   : > { %1503 = vmatpush3.bf16.msra.mxu0 %v1703_v21  ;;  %1534 = vmatprep.subr.bf16.mxu1 %v1711_v22 }
 0x18d   : > { %1504 = vmatprep.subr.bf16.mxu0 %v1704_v34 }
 0x18f   : > { %1535 = vmatpush3.bf16.msra.mxu1 %v1711_v22 }
 0x190   : > { %1505 = vmatpush3.bf16.msra.mxu0 %v1704_v34  ;;  %1536 = vmatprep.subr.bf16.mxu1 %v1712_v48 }
 0x191   : > { %1506 = vmatprep.subr.bf16.mxu0 %v1705_v16 }
 0x193   : > { %1537 = vmatpush3.bf16.msra.mxu1 %v1712_v48 }
 0x194   : > { %1507 = vmatpush3.bf16.msra.mxu0 %v1705_v16  ;;  %1538 = vmatprep.subr.bf16.mxu1 %v1713_v7 }
 0x195   : > { %1508 = vmatprep.subr.bf16.mxu0 %v1706_v49 }
 0x197   : > { %1539 = vmatpush3.bf16.msra.mxu1 %v1713_v7 }
 0x198   : > { %1509 = vmatpush3.bf16.msra.mxu0 %v1706_v49  ;;  %1540 = vmatprep.subr.bf16.mxu1 %v1714_v30 }
 0x199   : > { %1510 = vmatprep.subr.bf16.mxu0 %v1707_v17 }
 0x19b   : > { %1541 = vmatpush3.bf16.msra.mxu1 %v1714_v30 }
 0x19c   : > { %1511 = vmatpush3.bf16.msra.mxu0 %v1707_v17  ;;  %1542 = vmatprep.subr.bf16.mxu1 %v1715_v41 }
 0x19d   : > { %1512 = vmatprep.subr.bf16.mxu0 %v1708_v18 }
 0x19f   : > { %1543 = vmatpush3.bf16.msra.mxu1 %v1715_v41 }
 0x1a0   : > { %1513 = vmatpush3.bf16.msra.mxu0 %v1708_v18  ;;  %1544 = vmatprep.subr.bf16.mxu1 %v1716_v8 }
 0x1a3   : > { %1515 = vmatmul.mubr.bf16.vlgmr.msra.gmra.mrb[0].mxu0 %v724_v47  ;;  %1545 = vmatpush3.bf16.msra.mxu1 %v1716_v8 }
 0x1a4   : > { %1518 = vmatprep.mubr.bf16.mxu0 %v725_v19 }
 0x1ab   : > { %1519 = vmatmul.mubr.bf16.gmra.mrb[4].mxu0 %v726_v43 }
 0x1ac   : > { %1522 = vmatprep.mubr.bf16.mxu0 %v727_v6 }
 0x1b3   : > { %1523 = vmatmul.mubr.bf16.gmra.mrb[8].mxu0 %v728_v25 }
 0x1b4   : > { %1526 = vmatprep.mubr.bf16.mxu0 %v729_v59 }
 0x1bb   : > { %1527 = vmatmul.mubr.bf16.gmra.mrb[12].mxu0 %v730_v44 }
 0x276   : > { %v1516_v45 = vpop.f32.mrb[0].mxu0 }
 0x277   : > { %v845_v26 = vadd.f32 %v1516_v45, %v2580_v55  ;;  %v836_v9 = vpop.f32.mrb[1].mxu0 }
 0x278   : > { %v837_v2 = vadd.f32 %v2580_v55, %v836_v9  ;;  %v1517_v27 = vpop.f32.mrb[2].mxu0 }
 0x279   : > { %v917_v28 = vmul.f32 0.70710677, %v845_v26  ;;  %v848_v36 = vadd.f32 %v1517_v27, %v2580_v55  ;;  %v839_v29 = vpop.f32.mrb[3].mxu0  ;;  %v901_v50 = vmul.f32 0.5, %v845_v26 }
 0x27a   : > { %v915_v33 = vmul.f32 0.70710677, %v837_v2  ;;  %v840_v35 = vadd.f32 %v2580_v55, %v839_v29  ;;  %v899_v42 = vmul.f32 0.5, %v837_v2 }
 0x27b   : > { %1717 = verf.f32 %v917_v28  ;;  %v918_v1 = vmul.f32 0.70710677, %v848_v36  ;;  %v902_v56 = vmul.f32 0.5, %v848_v36 }
 0x27c   : > { %1719 = verf.f32 %v915_v33  ;;  %v916_v10 = vmul.f32 0.70710677, %v840_v35  ;;  %v900_v16 = vmul.f32 0.5, %v840_v35 }
 0x27d   : > { %1721 = verf.f32 %v918_v1 }
 0x27e   : > { %1723 = verf.f32 %v916_v10  ;;  %v1520_v60 = vpop.f32.mrb[4].mxu0 }
 0x27f   : > { %v861_v0 = vadd.f32 %v1520_v60, %v2580_v55  ;;  %v852_v11 = vpop.f32.mrb[5].mxu0 }
 0x280   : > { %v853_v61 = vadd.f32 %v2580_v55, %v852_v11  ;;  %v1521_v51 = vpop.f32.mrb[6].mxu0 }
 0x281   : > { %v921_v23 = vmul.f32 0.70710677, %v861_v0  ;;  %v864_v31 = vadd.f32 %v1521_v51, %v2580_v55  ;;  %v855_v46 = vpop.f32.mrb[7].mxu0  ;;  %v905_v45 = vmul.f32 0.5, %v861_v0 }
 0x282   : > { %v919_v40 = vmul.f32 0.70710677, %v853_v61  ;;  %v856_v54 = vadd.f32 %v2580_v55, %v855_v46  ;;  %v903_v28 = vmul.f32 0.5, %v853_v61 }
 0x283   : > { %1725 = verf.f32 %v921_v23  ;;  %v922_v12 = vmul.f32 0.70710677, %v864_v31  ;;  %v906_v26 = vmul.f32 0.5, %v864_v31 }
 0x284   : > { %1727 = verf.f32 %v919_v40  ;;  %v920_v62 = vmul.f32 0.70710677, %v856_v54  ;;  %v904_v36 = vmul.f32 0.5, %v856_v54 }
 0x285   : > { %v1718_v3 = vpop.eup %1717  ;;  %1729 = verf.f32 %v922_v12 }
 0x286   : > { %v1720_v13 = vpop.eup %1719  ;;  %1731 = verf.f32 %v920_v62  ;;  %v1524_v20 = vpop.f32.mrb[8].mxu0  ;;  %v949_v4 = vadd.f32 1.0, %v1718_v3 }
 0x287   : > { %v1722_v37 = vpop.eup %1721  ;;  %v2591_v63 = vadd.f32 %v1524_v20, %v2580_v55  ;;  %v868_v38 = vpop.f32.mrb[9].mxu0  ;;  %v947_v15 = vadd.f32 1.0, %v1720_v13 }
 0x288   : > { %v1724_v52 = vpop.eup %1723  ;;  %v950_v14 = vadd.f32 1.0, %v1722_v37  ;;  %v2594_v53 = vadd.f32 %v2580_v55, %v868_v38  ;;  %v1525_v57 = vpop.f32.mrb[10].mxu0  ;;  %v965_v49 = vmul.f32 %v949_v4, %v901_v50 }
 0x289   : > { %v925_v24 = vmul.f32 0.70710677, %v2591_v63  ;;  %v880_v58 = vadd.f32 %v1525_v57, %v2580_v55  ;;  %v871_v21 = vpop.f32.mrb[11].mxu0  ;;  %v948_v34 = vadd.f32 1.0, %v1724_v52  ;;  %v963_v47 = vmul.f32 %v947_v15, %v899_v42 }
 0x28a   : > { %v966_v5 = vmul.f32 %v950_v14, %v902_v56  ;;  %v923_v39 = vmul.f32 0.70710677, %v2594_v53  ;;  %v872_v32 = vadd.f32 %v2580_v55, %v871_v21  ;;  %v909_v37 = vmul.f32 0.5, %v2591_v63 }
 0x28b   : > { %1733 = verf.f32 %v925_v24  ;;  %v926_v17 = vmul.f32 0.70710677, %v880_v58  ;;  %v964_v19 = vmul.f32 %v948_v34, %v900_v16  ;;  %v910_v50 = vmul.f32 0.5, %v880_v58 }
 0x28c   : > { %1735 = verf.f32 %v923_v39  ;;  %v924_v18 = vmul.f32 0.70710677, %v872_v32  ;;  %v996_v6 = vpack.c.bf16 %v966_v5, %v965_v49  ;;  %v908_v38 = vmul.f32 0.5, %v872_v32 }
 0x28d   : > { %v1726_v43 = vpop.eup %1725  ;;  %1737 = verf.f32 %v926_v17  ;;  %v995_v22 = vpack.c.bf16 %v964_v19, %v963_v47 }
 0x28e   : > { %v1728_v25 = vpop.eup %1727  ;;  %v953_v59 = vadd.f32 1.0, %v1726_v43  ;;  %1739 = verf.f32 %v924_v18  ;;  %v1528_v44 = vpop.f32.mrb[12].mxu0 }
 0x28f   : > { %v1730_v48 = vpop.eup %1729  ;;  %v951_v7 = vadd.f32 1.0, %v1728_v25  ;;  %v893_v30 = vadd.f32 %v1528_v44, %v2580_v55  ;;  %v884_v41 = vpop.f32.mrb[13].mxu0  ;;  %1546 = vmatprep.mubr.bf16.mxu1 %v995_v22  ;;  %v981_v44 = vld [vmem:[#allocation3 + $0x10] sm:$0xff]  ;;  %v979_v22 = vld [vmem:[#allocation3] sm:$0xff] }
 0x290   : > { %v1732_v8 = vpop.eup %1731  ;;  %v954_v9 = vadd.f32 1.0, %v1730_v48  ;;  %v885_v2 = vadd.f32 %v2580_v55, %v884_v41  ;;  %v1529_v27 = vpop.f32.mrb[14].mxu0  ;;  %1547 = vmatmul.mubr.bf16.vlgmr.msra.gmra.mrb[0].mxu1 %v996_v6  ;;  %v969_v1 = vmul.f32 %v953_v59, %v905_v45 }
 0x291   : > { %v952_v29 = vadd.f32 1.0, %v1732_v8  ;;  %v929_v33 = vmul.f32 0.70710677, %v893_v30  ;;  %v887_v35 = vpop.f32.mrb[15].mxu0  ;;  %v896_v11 = vadd.f32 %v1529_v27, %v2580_v55  ;;  %v967_v51 = vmul.f32 %v951_v7, %v903_v28  ;;  %v982_v7 = vld [vmem:[#allocation3 + $0x18] sm:$0xff]  ;;  %v980_v8 = vld [vmem:[#allocation3 + $0x8] sm:$0xff] }
 0x292   : > { %v970_v10 = vmul.f32 %v954_v9, %v906_v26  ;;  %v927_v60 = vmul.f32 0.70710677, %v885_v2  ;;  %v888_v0 = vadd.f32 %v2580_v55, %v887_v35  ;;  %v907_v55 = vmul.f32 0.5, %v2594_v53  ;;  %v985_v28 = vld [vmem:[#allocation3 + $0x30] sm:$0xff] }
 0x293   : > { %v968_v23 = vmul.f32 %v952_v29, %v904_v36  ;;  %1741 = verf.f32 %v929_v33  ;;  %v930_v31 = vmul.f32 0.70710677, %v896_v11  ;;  %v913_v58 = vmul.f32 0.5, %v893_v30  ;;  %v983_v36 = vld [vmem:[#allocation3 + $0x20] sm:$0xff]  ;;  %v986_v33 = vld [vmem:[#allocation3 + $0x38] sm:$0xff] }
 0x294   : > { %1743 = verf.f32 %v927_v60  ;;  %v998_v46 = vpack.c.bf16 %v970_v10, %v969_v1  ;;  %v928_v61 = vmul.f32 0.70710677, %v888_v0  ;;  %v914_v49 = vmul.f32 0.5, %v896_v11  ;;  %v984_v10 = vld [vmem:[#allocation3 + $0x28] sm:$0xff] }
 0x295   : > { %v1734_v40 = vpop.eup %1733  ;;  %v997_v54 = vpack.c.bf16 %v968_v23, %v967_v51  ;;  %1745 = verf.f32 %v930_v31  ;;  %v911_v53 = vmul.f32 0.5, %v885_v2  ;;  %v912_v32 = vmul.f32 0.5, %v888_v0  ;;  %v989_v31 = vld [vmem:[#allocation3 + $0x50] sm:$0xff] }
 0x296   : > { %v1736_v12 = vpop.eup %1735  ;;  %v957_v62 = vadd.f32 1.0, %v1734_v40  ;;  %1747 = verf.f32 %v928_v61  ;;  %v990_v61 = vld [vmem:[#allocation3 + $0x58] sm:$0xff] }
 0x297   : > { %v1738_v3 = vpop.eup %1737  ;;  %v955_v13 = vadd.f32 1.0, %v1736_v12  ;;  %1550 = vmatprep.mubr.bf16.mxu1 %v997_v54 }
 0x298   : > { %v1740_v20 = vpop.eup %1739  ;;  %v958_v4 = vadd.f32 1.0, %v1738_v3  ;;  %1551 = vmatmul.mubr.bf16.gmra.mrb[4].mxu1 %v998_v46  ;;  %v973_v56 = vmul.f32 %v957_v62, %v909_v37  ;;  %v987_v46 = vld [vmem:[#allocation3 + $0x40] sm:$0xff]  ;;  %v988_v62 = vld [vmem:[#allocation3 + $0x48] sm:$0xff] }
 0x299   : > { %v956_v52 = vadd.f32 1.0, %v1740_v20  ;;  %v971_v57 = vmul.f32 %v955_v13, %v907_v55  ;;  %v991_v55 = vld [vmem:[#allocation3 + $0x60] sm:$0xff] }
 0x29a   : > { %v974_v14 = vmul.f32 %v958_v4, %v910_v50  ;;  %v993_v4 = vld [vmem:[#allocation3 + $0x70] sm:$0xff] }
 0x29b   : > { %v972_v15 = vmul.f32 %v956_v52, %v908_v38  ;;  %v994_v52 = vld [vmem:[#allocation3 + $0x78] sm:$0xff] }
 0x29c   : > { %v1000_v42 = vpack.c.bf16 %v974_v14, %v973_v56 }
 0x29d   : > { %v1742_v24 = vpop.eup %1741  ;;  %v999_v21 = vpack.c.bf16 %v972_v15, %v971_v57  ;;  %v992_v57 = vld [vmem:[#allocation3 + $0x68] sm:$0xff] }
 0x29e   : > { %v1744_v34 = vpop.eup %1743  ;;  %v961_v5 = vadd.f32 1.0, %v1742_v24 }
 0x29f   : > { %1554 = vmatprep.mubr.bf16.mxu1 %v999_v21  ;;  %v1746_v16 = vpop.eup %1745  ;;  %v959_v39 = vadd.f32 1.0, %v1744_v34 }
 0x2a0   : > { %v1748_v63 = vpop.eup %1747  ;;  %v962_v17 = vadd.f32 1.0, %v1746_v16  ;;  %1555 = vmatmul.mubr.bf16.gmra.mrb[8].mxu1 %v1000_v42  ;;  %v977_v47 = vmul.f32 %v961_v5, %v913_v58  ;;  %v1453_v16 = vld [vmem:[%s2714_s6] ss:$0 sm:$0xff] (!%p1452_p4) }
 0x2a1   : > { %v960_v18 = vadd.f32 1.0, %v1748_v63  ;;  %v975_v43 = vmul.f32 %v959_v39, %v911_v53 }
 0x2a2   : > { %v978_v19 = vmul.f32 %v962_v17, %v914_v49 }
 0x2a3   : > { %v976_v6 = vmul.f32 %v960_v18, %v912_v32 }
 0x2a4   : > { %v1002_v25 = vpack.c.bf16 %v978_v19, %v977_v47 }
 0x2a5   : > { %v1001_v59 = vpack.c.bf16 %v976_v6, %v975_v43 }
 0x2a7   : > { %1558 = vmatprep.mubr.bf16.mxu1 %v1001_v59 }
 0x2a8   : > { %1559 = vmatmul.mubr.bf16.gmra.mrb[12].mxu1 %v1002_v25 }
 0x363   : > { %v1548_v48 = vpop.f32.mrb[0].mxu1 }
 0x364   : > { %v1166_v41 = vadd.f32 %v1548_v48, %v981_v44  ;;  %v1101_v30 = vpop.f32.mrb[1].mxu1 }
 0x365   : > { %v1164_v45 = vadd.f32 %v1101_v30, %v979_v22  ;;  %v1549_v26 = vpop.f32.mrb[2].mxu1 }
 0x366   : > { %1182 = vst [vmem:[#allocation3 + $0x10] sm:$0xff] %v1166_v41  ;;  %v1167_v9 = vadd.f32 %v1549_v26, %v982_v7  ;;  %v1104_v2 = vpop.f32.mrb[3].mxu1 }
 0x367   : > { %1180 = vst [vmem:[#allocation3] sm:$0xff] %v1164_v45  ;;  %v1165_v27 = vadd.f32 %v1104_v2, %v980_v8 }
 0x368   : > { %1183 = vst [vmem:[#allocation3 + $0x18] sm:$0xff] %v1167_v9 }
 0x369   : > { %1181 = vst [vmem:[#allocation3 + $0x8] sm:$0xff] %v1165_v27 }
 0x36b   : > { %v1552_v29 = vpop.f32.mrb[4].mxu1 }
 0x36c   : > { %v1170_v35 = vadd.f32 %v1552_v29, %v985_v28  ;;  %v1117_v1 = vpop.f32.mrb[5].mxu1 }
 0x36d   : > { %v1168_v60 = vadd.f32 %v1117_v1, %v983_v36  ;;  %v1553_v11 = vpop.f32.mrb[6].mxu1  ;;  %v1202_v49 = vld [vmem:[#allocation3 + $0x10] sm:$0xff] (!%p1452_p4) }
 0x36e   : > { %1186 = vst [vmem:[#allocation3 + $0x30] sm:$0xff] %v1170_v35  ;;  %v1171_v51 = vadd.f32 %v1553_v11, %v986_v33  ;;  %v1120_v23 = vpop.f32.mrb[7].mxu1  ;;  %v1200_v5 = vld [vmem:[#allocation3] sm:$0xff] (!%p1452_p4)  ;;  %v1225_v32 = vadd.f32 (!%p1452_p4), %v1453_v16, %v1202_v49 }
 0x36f   : > { %1184 = vst [vmem:[#allocation3 + $0x20] sm:$0xff] %v1168_v60  ;;  %v1169_v0 = vadd.f32 %v1120_v23, %v984_v10  ;;  %v1223_v63 = vadd.f32 (!%p1452_p4), %v1453_v16, %v1200_v5  ;;  %v1203_v17 = vld [vmem:[#allocation3 + $0x18] sm:$0xff] (!%p1452_p4) }
 0x370   : > { %1187 = vst [vmem:[#allocation3 + $0x38] sm:$0xff] %v1171_v51  ;;  %v1201_v39 = vld [vmem:[#allocation3 + $0x8] sm:$0xff] (!%p1452_p4)  ;;  %v1226_v18 = vadd.f32 (!%p1452_p4), %v1453_v16, %v1203_v17  ;;  %1241 = vst [vmem:[%s2295_s23 + $0x10] sm:$0xff] (!%p1452_p4), %v1225_v32 }
 0x371   : > { %1185 = vst [vmem:[#allocation3 + $0x28] sm:$0xff] %v1169_v0  ;;  %v1224_v58 = vadd.f32 (!%p1452_p4), %v1453_v16, %v1201_v39  ;;  %1239 = vst [vmem:[%s2295_s23] sm:$0xff] (!%p1452_p4), %v1223_v63 }
 0x372   : > { %1242 = vst [vmem:[%s2295_s23 + $0x18] sm:$0xff] (!%p1452_p4), %v1226_v18 }
 0x373   : > { %v1556_v40 = vpop.f32.mrb[8].mxu1  ;;  %1240 = vst [vmem:[%s2295_s23 + $0x8] sm:$0xff] (!%p1452_p4), %v1224_v58 }
 0x374   : > { %v1174_v54 = vadd.f32 %v1556_v40, %v989_v31  ;;  %v1133_v12 = vpop.f32.mrb[9].mxu1 }
 0x375   : > { %v1172_v3 = vadd.f32 %v1133_v12, %v987_v46  ;;  %v1557_v13 = vpop.f32.mrb[10].mxu1  ;;  %v1206_v43 = vld [vmem:[#allocation3 + $0x30] sm:$0xff] (!%p1452_p4) }
 0x376   : > { %1190 = vst [vmem:[#allocation3 + $0x50] sm:$0xff] %v1174_v54  ;;  %v1175_v20 = vadd.f32 %v1557_v13, %v990_v61  ;;  %v1136_v37 = vpop.f32.mrb[11].mxu1  ;;  %v1204_v53 = vld [vmem:[#allocation3 + $0x20] sm:$0xff] (!%p1452_p4)  ;;  %v1229_v59 = vadd.f32 (!%p1452_p4), %v1453_v16, %v1206_v43 }
 0x377   : > { %1188 = vst [vmem:[#allocation3 + $0x40] sm:$0xff] %v1172_v3  ;;  %v1173_v50 = vadd.f32 %v1136_v37, %v988_v62  ;;  %v1227_v47 = vadd.f32 (!%p1452_p4), %v1453_v16, %v1204_v53  ;;  %v1207_v6 = vld [vmem:[#allocation3 + $0x38] sm:$0xff] (!%p1452_p4) }
 0x378   : > { %1191 = vst [vmem:[#allocation3 + $0x58] sm:$0xff] %v1175_v20  ;;  %v1205_v19 = vld [vmem:[#allocation3 + $0x28] sm:$0xff] (!%p1452_p4)  ;;  %v1230_v44 = vadd.f32 (!%p1452_p4), %v1453_v16, %v1207_v6  ;;  %1245 = vst [vmem:[%s2295_s23 + $0x30] sm:$0xff] (!%p1452_p4), %v1229_v59 }
 0x379   : > { %1189 = vst [vmem:[#allocation3 + $0x48] sm:$0xff] %v1173_v50  ;;  %v1228_v25 = vadd.f32 (!%p1452_p4), %v1453_v16, %v1205_v19  ;;  %1243 = vst [vmem:[%s2295_s23 + $0x20] sm:$0xff] (!%p1452_p4), %v1227_v47 }
 0x37a   : > { %1246 = vst [vmem:[%s2295_s23 + $0x38] sm:$0xff] (!%p1452_p4), %v1230_v44 }
 0x37b   : > { %v1560_v38 = vpop.f32.mrb[12].mxu1  ;;  %1199 = sbr.rel (%p1452_p4) target bundleno = 908 (0x38c), region = 68  ;;  %1244 = vst [vmem:[%s2295_s23 + $0x28] sm:$0xff] (!%p1452_p4), %v1228_v25 }
 0x37c   : > { %v1178_v56 = vadd.f32 %v1560_v38, %v993_v4  ;;  %v1149_v14 = vpop.f32.mrb[13].mxu1 }
 0x37d   : > { %v1176_v15 = vadd.f32 %v1149_v14, %v991_v55  ;;  %v1561_v42 = vpop.f32.mrb[14].mxu1  ;;  %v1210_v7 = vld [vmem:[#allocation3 + $0x50] sm:$0xff] (!%p1452_p4) }
 0x37e   : > { %1194 = vst [vmem:[#allocation3 + $0x70] sm:$0xff] %v1178_v56  ;;  %v1179_v24 = vadd.f32 %v1561_v42, %v994_v52  ;;  %v1152_v21 = vpop.f32.mrb[15].mxu1  ;;  %v1208_v22 = vld [vmem:[#allocation3 + $0x40] sm:$0xff] (!%p1452_p4)  ;;  %v1233_v8 = vadd.f32 (!%p1452_p4), %v1453_v16, %v1210_v7 }
 0x37f   : > { %1192 = vst [vmem:[#allocation3 + $0x60] sm:$0xff] %v1176_v15  ;;  %v1177_v34 = vadd.f32 %v1152_v21, %v992_v57  ;;  %v1231_v41 = vadd.f32 (!%p1452_p4), %v1453_v16, %v1208_v22  ;;  %v1211_v45 = vld [vmem:[#allocation3 + $0x58] sm:$0xff] (!%p1452_p4) }
 0x380   : > { %1195 = vst [vmem:[#allocation3 + $0x78] sm:$0xff] %v1179_v24  ;;  %v1209_v48 = vld [vmem:[#allocation3 + $0x48] sm:$0xff] (!%p1452_p4)  ;;  %v1234_v2 = vadd.f32 (!%p1452_p4), %v1453_v16, %v1211_v45  ;;  %1249 = vst [vmem:[%s2295_s23 + $0x50] sm:$0xff] (!%p1452_p4), %v1233_v8 }
 0x381   : > { %1193 = vst [vmem:[#allocation3 + $0x68] sm:$0xff] %v1177_v34  ;;  %v1232_v30 = vadd.f32 (!%p1452_p4), %v1453_v16, %v1209_v48  ;;  %1247 = vst [vmem:[%s2295_s23 + $0x40] sm:$0xff] (!%p1452_p4), %v1231_v41 }
 0x382   : > { %1250 = vst [vmem:[%s2295_s23 + $0x58] sm:$0xff] %v1234_v2 }
 0x383   : > { %1248 = vst [vmem:[%s2295_s23 + $0x48] sm:$0xff] %v1232_v30 }
 0x385   : > { %v1214_v36 = vld [vmem:[#allocation3 + $0x70] sm:$0xff] }
 0x386   : > { %v1212_v26 = vld [vmem:[#allocation3 + $0x60] sm:$0xff]  ;;  %v1237_v33 = vadd.f32 %v1453_v16, %v1214_v36 }
 0x387   : > { %v1235_v27 = vadd.f32 %v1453_v16, %v1212_v26  ;;  %v1215_v29 = vld [vmem:[#allocation3 + $0x78] sm:$0xff] }
 0x388   : > { %v1213_v9 = vld [vmem:[#allocation3 + $0x68] sm:$0xff]  ;;  %v1238_v35 = vadd.f32 %v1453_v16, %v1215_v29  ;;  %1253 = vst [vmem:[%s2295_s23 + $0x70] sm:$0xff] %v1237_v33 }
 0x389   : > { %v1236_v28 = vadd.f32 %v1453_v16, %v1213_v9  ;;  %1251 = vst [vmem:[%s2295_s23 + $0x60] sm:$0xff] %v1235_v27 }
 0x38a   : > { %1254 = vst [vmem:[%s2295_s23 + $0x78] sm:$0xff] %v1238_v35 }
 0x38b   : > { %1252 = vst [vmem:[%s2295_s23 + $0x68] sm:$0xff] %v1236_v28 }
 0x38c PF: > { %s1256_s30 = scalar_lea.sflag [#allocation6], %s2267_s0  ;;  %p2746_p13 = scmp.ne.s32.totalorder %s2740_s18, 0 }
 0x38d   : > { %s2747_s21 = sld [smem:[#allocation16_spill]] (%p2746_p13) }
 0x38e   : > { %1262 = sbr.rel (!%p2746_p13) target bundleno = 948 (0x3b4), region = 72 }
 0x393   : > { %s1455_s17 = sshll.u32 (%p2746_p13), %s2747_s21, 4 }
 0x394   : > { %s1264_s10 = ssub.s32 (%p2746_p13), 33, %s1455_s17 }
 0x395   : > { %p1265_p3 = scmp.lt.s32.totalorder %s1264_s10, 16 }
 0x397   : > { %s2775_s10 = smov (!%p1265_p3, %s1264_s10), 16 }
 0x398   : > { %s2630_s24 = sshll.u32 %s2775_s10, 7 }
 0x399   : > { %s1269_s20 = ssub.s32 2048, %s2630_s24 }
 0x39a   : > { %1270 = vsyncadd %s1256_s30, %s1269_s20  ;;  %p1457_p11 = scmp.ne.s32.totalorder %s2630_s24, 0  ;;  %s1465_s18 = sshll.u32 %s2747_s21, 11 }
 0x39b   : > { %s2748_s27 = sld [smem:[#allocation24_spill]]  ;;  %s1275_s8 = sshll.u32 %s2295_s23, 4  ;;  %s2643_s8 = int_to_ptr.vmem [resolvable:$true] %s1275_s8 }
 0x39c   : > { %s1833_s14 = scalar_lea.vmem %s2643_s8, %s2630_s24  ;;  %s1970_s22 = smov [#allocation10]  }
 0x39d   : > { %p1834_p10 = scmp.ne.s32.totalorder %s2643_s8, %s1833_s14  ;;  %s1837_s16 = sshll.u32 %s1970_s22, 4  ;;  %s1838_s16 = int_to_ptr.vmem [resolvable:$false] %s1837_s16 }
 0x39e   : > { %s1839_s13 = scalar_lea.vmem %s1838_s16, 4096  ;;  %p1840_p9 = scmp.lt.s32.totalorder %s2643_s8, %s1838_s16 }
 0x39f   : > { %p1835_p2 = pnand %p1834_p10, %p1457_p11  ;;  %p1841_p1 = scmp.lt.s32.totalorder %s1839_s13, %s1833_s14 }
 0x3a1   : > { %s2749_s7 = smov %s2748_s27  ;;  %s2640_s15 = scalar_lea.hbm %s2748_s27, %s1465_s18 }
 0x3a2   : > { %p1836_p6 = pneg %p1835_p2  ;;  %p1842_p0 = por %p1841_p1, %p1840_p9 }
 0x3a4   : > { %p1843_p5 = pnand %p1842_p0, %p1836_p6 }
 0x3a6   : > { %1846 = shalt.err (!%p1843_p5)
}
 0x3a7   : > { %s1847_s23 = scalar_lea.hbm %s2640_s15, %s2630_s24  ;;  %s1851_s17 = scalar_lea.hbm %s2749_s7, 4224 }
 0x3a8   : > { %p1848_p12 = scmp.ne.s32.totalorder %s2640_s15, %s1847_s23  ;;  %p1852_p4 = scmp.lt.u32.totalorder %s2640_s15, %s2749_s7 }
 0x3a9   : > { %p1853_p13 = scmp.lt.u32.totalorder %s1851_s17, %s1847_s23  ;;  %p1855_p10 = scmp.lt.u32.totalorder %s1847_s23, %s2640_s15 }
 0x3aa   : > { %p1849_p8 = pnand %p1848_p12, %p1457_p11 }
 0x3ab   : > { %p1854_p3 = por %p1853_p13, %p1852_p4 }
 0x3ac   : > { %p1850_p7 = pneg %p1849_p8 }
 0x3ad   : > { %p1856_p2 = por %p1855_p10, %p1854_p3 }
 0x3af   : > { %p1857_p6 = pnand %p1856_p2, %p1850_p7 }
 0x3b1   : > { %1860 = shalt.err (!%p1857_p6)
}
 0x3b2   : > { %s1971_s18 = smov 128   ;;  %s1972_s29 = smov 8  }
 0x3b3   : > { %1281 = dma.vmem_to_hbm [thread:$0]  (%p1457_p11), %s2643_s8, %s2630_s24, %s2640_s15, %s1256_s30, %s1971_s18, %s1971_s18, %s1972_s29  }
 0x3b4 PF: > { %s2750_s12 = sld [smem:[#allocation14_spill]]  ;;  %s2751_s27 = sld [smem:[#allocation22_spill]] }
 0x3b5   : > { %p1572_p9 = scmp.ge.s32.totalorder %s1959_s11, 2 }
 0x3ba   : > { %s1290_s14 = sand.u32 1, %s2750_s12   ;;  %p2752_p1 = scmp.ne.s32.totalorder %s2751_s27, 0 }
 0x3bb   : > { %s1291_s22 = scalar_lea.sflag [#allocation6], %s1290_s14 }
 0x3bc   : > { %p1569_p0 = pnand %p1572_p9, %p2752_p1 }
 0x3be   : > { %1914 = dma.done.wait (!%p1569_p0), %s1291_s22, 2048  }
 0x3bf   : > { %1916 = vsyncadd (!%p1569_p0), %s1291_s22, 4294965248  ;;  %s26_s11 = sadd.s32 1, %s1959_s11   ;;  %s2753_s16 = sld [smem:[#allocation20_spill]] }
 0x3c0   : > { %p23_p5 = scmp.ge.s32.totalorder %s26_s11, 8   ;;  %s2754_s0 = sld [smem:[#allocation15_spill]] }
 0x3c1   : > { %s2755_s29 = sld [smem:[#allocation21_spill]]  ;;  %s2756_s8 = sld [smem:[#allocation17_spill]] }
 0x3c2   : > { %s2757_s15 = sld [smem:[#allocation18_spill]]  ;;  %s2758_s10 = sld [smem:[#allocation19_spill]] }
 0x3c3   : > { %s2759_s24 = smov %s1923_s25  ;;  %s2760_s25 = smov %s1927_s26 }
 0x3c4   : > { %s2762_s27 = smov %s1935_s28  ;;  %s2764_s30 = smov %s1951_s9 }
 0x3c5   : > { %s2761_s26 = smov %s2753_s16  ;;  %25 = sbr.rel (!%p23_p5) target bundleno = 14 (0xe), region = 128 }
 0x3c6   : > { %s2763_s28 = smov %s2754_s0 }
 0x3c8   : > { %s2765_s9 = smov %s2757_s15 }
 0x3cc   :  { %1296 = vsyncpa [#allocation5], 1 }
 0x3cd   :  { %1298 = vsyncpa [#allocation5 + $0x1], 1 }
 0x3ce   :  { %1299 = vsyncpa [#allocation8], 1 }
 0x3cf   :  { %1301 = vsyncpa [#allocation8 + $0x1], 1 }
 0x3d0   :  { %1302 = vsyncpa [#allocation6], 1 }
 0x3d1   :  { %1304 = vsyncpa [#allocation6 + $0x1], 1 }

</bundles_post_ra>
